<compile_context>
chip_gen: v5e
topology: v5e:2x2
jax: 0.10.0
libtpu: 0.0.40
codegen_flags: <defaults>
</compile_context>

<pallas_src>
import jax
import jax.numpy as jnp
from jax.experimental import pallas as pl
from jax.experimental.pallas import tpu as pltpu

# ----------------------------- config (small) -------------------------------
B, S = 2, 8            # batch, sequence length
H = 128                # hidden size
NH = 4                 # attention heads
HD = H // NH           # head dim
FFN = 256              # intermediate (FFN) size
LAYERS = 2             # encoder layers
VOCAB = 64             # vocab size
TYPE_VOCAB = 2         # token-type vocab
MAX_POS = 16           # max position embeddings
EPS = 1e-12            # BERT LayerNorm eps


# ------------------------------ Pallas kernel --------------------------------
def _layernorm(x, g, b):
    # f32 VPU/EUP math (no bf16 elementwise; v5e has no bf16 VPU path).
    mean = jnp.mean(x, axis=-1, keepdims=True)
    var = jnp.mean(jnp.square(x - mean), axis=-1, keepdims=True)
    return (x - mean) * jax.lax.rsqrt(var + EPS) * g + b


def _encoder_kernel(emb_ref, emb_g_ref, emb_b_ref, mask_ref,
                    wqkv_ref, bqkv_ref, wo_ref, bo_ref, ln1_g_ref, ln1_b_ref,
                    w1_ref, b1_ref, w2_ref, b2_ref, ln2_g_ref, ln2_b_ref,
                    out_ref, x_vmem):
    layer = pl.program_id(1)

    # Embedding LayerNorm once per batch, straight into the resident scratch.
    @pl.when(layer == 0)
    def _():
        x_vmem[...] = _layernorm(emb_ref[...], emb_g_ref[...], emb_b_ref[...])

    x = x_vmem[...]                                            # (S, H) f32

    # ---------------- self-attention ----------------
    # Fused QKV projection: one (S, H) @ (H, 3H) bf16 MXU pass, f32 accum.
    qkv = jnp.dot(x.astype(jnp.bfloat16), wqkv_ref[...],
                  preferred_element_type=jnp.float32) + bqkv_ref[...]
    qkv_bf = qkv.astype(jnp.bfloat16)          # matmul operands only

    mask_b = mask_ref[...]                     # (1, S) additive key mask (f32)

    acc = jnp.zeros((S, H), jnp.float32)
    for h in range(NH):                        # static, unrolled (NH=4)
        cols = slice(h * HD, (h + 1) * HD)
        # sliced vregs reused by both the score and ctx matmuls
        qh = qkv_bf[:, cols]                                   # (S, HD)
        kh = qkv_bf[:, H + h * HD:H + (h + 1) * HD]
        vh = qkv_bf[:, 2 * H + h * HD:2 * H + (h + 1) * HD]
        # 1/sqrt(HD) is pre-folded into the Q weights; contract on head dim
        # directly (no transposed K copy).
        s = jax.lax.dot_general(qh, kh, (((1,), (1,)), ((), ())),
                                preferred_element_type=jnp.float32)
        s = s + mask_b                           # broadcast (1,S) -> (S,S)
        s = s - jnp.max(s, axis=-1, keepdims=True)
        p = jnp.exp(s)                           # f32 EUP
        p = p * pl.reciprocal(jnp.sum(p, axis=-1, keepdims=True), approx=True)
        ctx_h = jnp.dot(p.astype(jnp.bfloat16), vh,
                        preferred_element_type=jnp.float32)
        # fold the head-merge into the output projection:
        #   concat_h(ctx_h) @ wo == sum_h ctx_h @ wo[h*HD:(h+1)*HD, :]
        acc = acc + jnp.dot(ctx_h.astype(jnp.bfloat16), wo_ref[cols, :],
                            preferred_element_type=jnp.float32)
    attn_out = acc + bo_ref[...]                               # (S, H) f32

    x = _layernorm(attn_out + x, ln1_g_ref[...], ln1_b_ref[...])

    # ---------------- feed-forward ----------------
    inter = jnp.dot(x.astype(jnp.bfloat16), w1_ref[...],
                    preferred_element_type=jnp.float32) + b1_ref[...]
    # TODO(synk): HF BERT uses exact erf-GELU; tanh approximation used here.
    inter = jax.nn.gelu(inter, approximate=True)               # f32
    ffn_out = jnp.dot(inter.astype(jnp.bfloat16), w2_ref[...],
                      preferred_element_type=jnp.float32) + b2_ref[...]
    x = _layernorm(ffn_out + x, ln2_g_ref[...], ln2_b_ref[...])

    x_vmem[...] = x                            # carry activation to next layer

    @pl.when(layer == LAYERS - 1)
    def _():
        out_ref[...] = x[0:1, :]               # CLS row only, lane-dense (1,H)


def encoder_forward(emb, mask_add, p):
    def bcast(shape):
        # same full block every grid step (embedding LN params)
        return pl.BlockSpec(shape, lambda b, l: (0,) * len(shape))

    def per_batch(shape):
        # leading batch axis squeezed, pick batch b
        return pl.BlockSpec((None,) + shape,
                            lambda b, l: (b,) + (0,) * len(shape))

    def per_layer(shape):
        # stacked-by-layer parameter: squeeze the LAYERS axis, pick layer l
        return pl.BlockSpec((None,) + shape,
                            lambda b, l: (l,) + (0,) * len(shape))

    grid_spec = pltpu.PrefetchScalarGridSpec(
        num_scalar_prefetch=0,
        grid=(B, LAYERS),                 # batch parallel, layers innermost
        in_specs=[
            per_batch((S, H)),            # emb
            bcast((1, H)),                # emb_ln_g
            bcast((1, H)),                # emb_ln_b
            per_batch((1, S)),            # additive attention mask
            per_layer((H, 3 * H)),        # wqkv (bf16, Q-scale folded in)
            per_layer((1, 3 * H)),        # bqkv
            per_layer((H, H)),            # wo   (bf16)
            per_layer((1, H)),            # bo
            per_layer((1, H)),            # ln1_g
            per_layer((1, H)),            # ln1_b
            per_layer((H, FFN)),          # w1   (bf16)
            per_layer((1, FFN)),          # b1
            per_layer((FFN, H)),          # w2   (bf16)
            per_layer((1, H)),            # b2
            per_layer((1, H)),            # ln2_g
            per_layer((1, H)),            # ln2_b
        ],
        out_specs=pl.BlockSpec((None, 1, H), lambda b, l: (b, 0, 0)),
        scratch_shapes=[pltpu.VMEM((S, H), jnp.float32)],
    )
    out = pl.pallas_call(
        _encoder_kernel,
        out_shape=jax.ShapeDtypeStruct((B, 1, H), jnp.float32),
        grid_spec=grid_spec,
        compiler_params=pltpu.CompilerParams(
            dimension_semantics=("parallel", "arbitrary")),
    )(emb, p["emb_ln_g"], p["emb_ln_b"], mask_add,
      p["wqkv"], p["bqkv"], p["wo"], p["bo"], p["ln1_g"], p["ln1_b"],
      p["w1"], p["b1"], p["w2"], p["b2"], p["ln2_g"], p["ln2_b"])
    return out.reshape(B, H)                                   # CLS hidden


# -------------------------- parameters (synthetic) ---------------------------
def init_params(key):
    def nrm(k, shape, dtype=jnp.float32):
        return (0.02 * jax.random.normal(k, shape, dtype=jnp.float32)).astype(dtype)

    keys = iter(jax.random.split(key, 16))

    wqkv = 0.02 * jax.random.normal(next(keys), (LAYERS, H, 3 * H),
                                    dtype=jnp.float32)
    # Fold the 1/sqrt(HD) attention scale into the Q projection weights.
    # (The Q bias is zero here, so it needs no rescaling.)
    wqkv = wqkv.at[:, :, 0:H].multiply(1.0 / (HD ** 0.5))

    return {
        "word_emb": nrm(next(keys), (VOCAB, H)),
        "pos_emb": nrm(next(keys), (MAX_POS, H)),
        "type_emb": nrm(next(keys), (TYPE_VOCAB, H)),
        "emb_ln_g": jnp.ones((1, H), jnp.float32),
        "emb_ln_b": jnp.zeros((1, H), jnp.float32),
        # per-layer weights stacked along a leading LAYERS axis; matmul
        # weights stored bf16 (MXU-native), biases / LN params stay f32.
        "wqkv": wqkv.astype(jnp.bfloat16),
        "bqkv": jnp.zeros((LAYERS, 1, 3 * H), jnp.float32),
        "wo": nrm(next(keys), (LAYERS, H, H), jnp.bfloat16),
        "bo": jnp.zeros((LAYERS, 1, H), jnp.float32),
        "ln1_g": jnp.ones((LAYERS, 1, H), jnp.float32),
        "ln1_b": jnp.zeros((LAYERS, 1, H), jnp.float32),
        "w1": nrm(next(keys), (LAYERS, H, FFN), jnp.bfloat16),
        "b1": jnp.zeros((LAYERS, 1, FFN), jnp.float32),
        "w2": nrm(next(keys), (LAYERS, FFN, H), jnp.bfloat16),
        "b2": jnp.zeros((LAYERS, 1, H), jnp.float32),
        "ln2_g": jnp.ones((LAYERS, 1, H), jnp.float32),
        "ln2_b": jnp.zeros((LAYERS, 1, H), jnp.float32),
    }


# ------------------------------- forward pass --------------------------------
def demand_task_forward(params, input_ids, attention_mask=None, token_type_ids=None):
    """Equivalent of DemandTaskModel.forward: returns last_hidden_state[:, 0, :]."""
    if attention_mask is None:
        attention_mask = jnp.ones((B, S), jnp.int32)
    if token_type_ids is None:
        token_type_ids = jnp.zeros((B, S), jnp.int32)

    # Embedding table gathers are glue in plain JAX; LN happens in the kernel.
    pos_ids = jnp.arange(S)
    emb = (params["word_emb"][input_ids]
           + params["pos_emb"][pos_ids][None, :, :]
           + params["type_emb"][token_type_ids])               # (B, S, H) f32

    # Additive key mask: 0 where attended, -1e9 where masked (broadcast in-kernel).
    mask_add = ((1.0 - attention_mask.astype(jnp.float32)) * -1e9
                ).reshape(B, 1, S)

    return encoder_forward(emb, mask_add, params)              # (B, H) CLS


# ----------------------------------- main -------------------------------------
if __name__ == "__main__":
    key = jax.random.PRNGKey(0)
    k_param, k_ids = jax.random.split(key, 2)

    params = init_params(k_param)
    input_ids = jax.random.randint(k_ids, (B, S), 0, VOCAB, dtype=jnp.int32)
    attention_mask = jnp.ones((B, S), jnp.int32).at[:, -2:].set(0)  # pad last 2 tokens
    token_type_ids = jnp.zeros((B, S), jnp.int32)

    fwd = jax.jit(demand_task_forward)
    cls = fwd(params, input_ids, attention_mask, token_type_ids)
    cls = jax.block_until_ready(cls)
    assert cls.shape == (B, H) and cls.dtype == jnp.float32
    assert bool(jnp.all(jnp.isfinite(cls)))
    print("KERNEL_OK")
</pallas_src>

<mosaic_0001>
module attributes {stable_mosaic.version = 11 : i64} {
  func.func @_encoder_kernel(%arg0: i32, %arg1: i32, %arg2: memref<1x8x128xf32, #tpu.memory_space<vmem>>, %arg3: memref<1x128xf32, #tpu.memory_space<vmem>>, %arg4: memref<1x128xf32, #tpu.memory_space<vmem>>, %arg5: memref<1x1x8xf32, #tpu.memory_space<vmem>>, %arg6: memref<1x128x384xbf16, #tpu.memory_space<vmem>>, %arg7: memref<1x1x384xf32, #tpu.memory_space<vmem>>, %arg8: memref<1x128x128xbf16, #tpu.memory_space<vmem>>, %arg9: memref<1x1x128xf32, #tpu.memory_space<vmem>>, %arg10: memref<1x1x128xf32, #tpu.memory_space<vmem>>, %arg11: memref<1x1x128xf32, #tpu.memory_space<vmem>>, %arg12: memref<1x128x256xbf16, #tpu.memory_space<vmem>>, %arg13: memref<1x1x256xf32, #tpu.memory_space<vmem>>, %arg14: memref<1x256x128xbf16, #tpu.memory_space<vmem>>, %arg15: memref<1x1x128xf32, #tpu.memory_space<vmem>>, %arg16: memref<1x1x128xf32, #tpu.memory_space<vmem>>, %arg17: memref<1x1x128xf32, #tpu.memory_space<vmem>>, %arg18: memref<1x1x128xf32, #tpu.memory_space<vmem>>, %arg19: memref<8x128xf32, #tpu.memory_space<vmem>>) attributes {dimension_semantics = [#tpu.dimension_semantics<parallel>, #tpu.dimension_semantics<arbitrary>], iteration_bounds = array<i64: 2, 2>, scalar_prefetch = 0 : i64, scratch_operands = 1 : i64, tpu.core_type = #tpu.core_type<tc>, window_params = [{transform_indices = @transform_0, window_bounds = array<i64: 1, 8, 128>}, {pipeline_mode = #tpu.pipeline_mode<synchronous>, transform_indices = @transform_1, window_bounds = array<i64: 1, 128>}, {pipeline_mode = #tpu.pipeline_mode<synchronous>, transform_indices = @transform_2, window_bounds = array<i64: 1, 128>}, {transform_indices = @transform_3, window_bounds = array<i64: 1, 1, 8>}, {transform_indices = @transform_4, window_bounds = array<i64: 1, 128, 384>}, {transform_indices = @transform_5, window_bounds = array<i64: 1, 1, 384>}, {transform_indices = @transform_6, window_bounds = array<i64: 1, 128, 128>}, {transform_indices = @transform_7, window_bounds = array<i64: 1, 1, 128>}, {transform_indices = @transform_8, window_bounds = array<i64: 1, 1, 128>}, {transform_indices = @transform_9, window_bounds = array<i64: 1, 1, 128>}, {transform_indices = @transform_10, window_bounds = array<i64: 1, 128, 256>}, {transform_indices = @transform_11, window_bounds = array<i64: 1, 1, 256>}, {transform_indices = @transform_12, window_bounds = array<i64: 1, 256, 128>}, {transform_indices = @transform_13, window_bounds = array<i64: 1, 1, 128>}, {transform_indices = @transform_14, window_bounds = array<i64: 1, 1, 128>}, {transform_indices = @transform_15, window_bounds = array<i64: 1, 1, 128>}, {transform_indices = @transform_16, window_bounds = array<i64: 1, 1, 128>}]} {
    %c0_i32 = arith.constant 0 : i32
    %0 = arith.cmpi eq, %arg1, %c0_i32 : i32
    %1 = arith.extui %0 : i1 to i32
    %c0_i32_0 = arith.constant 0 : i32
    %2 = arith.cmpi ne, %1, %c0_i32_0 : i32
    scf.if %2 {
      %c0_87 = arith.constant 0 : index
      %c0_88 = arith.constant 0 : index
      %c0_89 = arith.constant 0 : index
      %199 = vector.load %arg2[%c0_87, %c0_88, %c0_89] : memref<1x8x128xf32, #tpu.memory_space<vmem>>, vector<1x8x128xf32>
      %200 = vector.shape_cast %199 : vector<1x8x128xf32> to vector<8x128xf32>
      %c0_90 = arith.constant 0 : index
      %c0_91 = arith.constant 0 : index
      %201 = vector.load %arg3[%c0_90, %c0_91] : memref<1x128xf32, #tpu.memory_space<vmem>>, vector<1x128xf32>
      %c0_92 = arith.constant 0 : index
      %c0_93 = arith.constant 0 : index
      %202 = vector.load %arg4[%c0_92, %c0_93] : memref<1x128xf32, #tpu.memory_space<vmem>>, vector<1x128xf32>
      %cst_94 = arith.constant dense<0.000000e+00> : vector<8xf32>
      %203 = vector.multi_reduction <add>, %200, %cst_94 [1] : vector<8x128xf32> to vector<8xf32>
      %204 = vector.shape_cast %203 : vector<8xf32> to vector<8x1xf32>
      %cst_95 = arith.constant 1.280000e+02 : f32
      %205 = vector.broadcast %cst_95 : f32 to vector<8x1xf32>
      %206 = arith.divf %204, %205 : vector<8x1xf32>
      %207 = vector.broadcast %206 : vector<8x1xf32> to vector<8x128xf32>
      %208 = arith.subf %200, %207 : vector<8x128xf32>
      %209 = arith.mulf %208, %208 : vector<8x128xf32>
      %cst_96 = arith.constant dense<0.000000e+00> : vector<8xf32>
      %210 = vector.multi_reduction <add>, %209, %cst_96 [1] : vector<8x128xf32> to vector<8xf32>
      %211 = vector.shape_cast %210 : vector<8xf32> to vector<8x1xf32>
      %cst_97 = arith.constant 1.280000e+02 : f32
      %212 = vector.broadcast %cst_97 : f32 to vector<8x1xf32>
      %213 = arith.divf %211, %212 : vector<8x1xf32>
      %214 = vector.broadcast %206 : vector<8x1xf32> to vector<8x128xf32>
      %215 = arith.subf %200, %214 : vector<8x128xf32>
      %cst_98 = arith.constant 9.99999996E-13 : f32
      %216 = vector.broadcast %cst_98 : f32 to vector<8x1xf32>
      %217 = arith.addf %213, %216 : vector<8x1xf32>
      %218 = math.rsqrt %217 : vector<8x1xf32>
      %219 = vector.broadcast %218 : vector<8x1xf32> to vector<8x128xf32>
      %220 = arith.mulf %215, %219 : vector<8x128xf32>
      %221 = vector.broadcast %201 : vector<1x128xf32> to vector<8x128xf32>
      %222 = arith.mulf %220, %221 : vector<8x128xf32>
      %223 = vector.broadcast %202 : vector<1x128xf32> to vector<8x128xf32>
      %224 = arith.addf %222, %223 : vector<8x128xf32>
      %c0_99 = arith.constant 0 : index
      %c0_100 = arith.constant 0 : index
      %225 = vector.load %arg19[%c0_99, %c0_100] : memref<8x128xf32, #tpu.memory_space<vmem>>, vector<8x128xf32>
      tpu.vector_store %arg19[%c0_99, %c0_100], %224 {strides = array<i32>} : memref<8x128xf32, #tpu.memory_space<vmem>>, vector<8x128xf32>,
    } else {
    }
    %c0 = arith.constant 0 : index
    %c0_1 = arith.constant 0 : index
    %3 = vector.load %arg19[%c0, %c0_1] : memref<8x128xf32, #tpu.memory_space<vmem>>, vector<8x128xf32>
    %4 = arith.truncf %3 : vector<8x128xf32> to vector<8x128xbf16>
    %c0_2 = arith.constant 0 : index
    %c0_3 = arith.constant 0 : index
    %c0_4 = arith.constant 0 : index
    %5 = vector.load %arg6[%c0_2, %c0_3, %c0_4] : memref<1x128x384xbf16, #tpu.memory_space<vmem>>, vector<1x128x384xbf16>
    %6 = vector.shape_cast %5 : vector<1x128x384xbf16> to vector<128x384xbf16>
    %cst = arith.constant dense<0.000000e+00> : vector<8x384xf32>
    %7 = tpu.matmul %4, %6, %cst {dimension_numbers = #tpu.dot_dimension_numbers<[1], [0], [0], [1], [0, 0, 1, 1], [], []>} : vector<8x128xbf16>, vector<128x384xbf16>, vector<8x384xf32> -> vector<8x384xf32>
    %c0_5 = arith.constant 0 : index
    %c0_6 = arith.constant 0 : index
    %c0_7 = arith.constant 0 : index
    %8 = vector.load %arg7[%c0_5, %c0_6, %c0_7] : memref<1x1x384xf32, #tpu.memory_space<vmem>>, vector<1x1x384xf32>
    %9 = vector.shape_cast %8 : vector<1x1x384xf32> to vector<1x384xf32>
    %10 = vector.broadcast %9 : vector<1x384xf32> to vector<8x384xf32>
    %11 = arith.addf %7, %10 : vector<8x384xf32>
    %12 = arith.truncf %11 : vector<8x384xf32> to vector<8x384xbf16>
    %c0_8 = arith.constant 0 : index
    %c0_9 = arith.constant 0 : index
    %c0_10 = arith.constant 0 : index
    %13 = vector.load %arg5[%c0_8, %c0_9, %c0_10] : memref<1x1x8xf32, #tpu.memory_space<vmem>>, vector<1x1x8xf32>
    %14 = vector.shape_cast %13 : vector<1x1x8xf32> to vector<1x8xf32>
    %cst_11 = arith.constant 0.000000e+00 : f32
    %15 = vector.broadcast %cst_11 : f32 to vector<8x128xf32>
    %16 = vector.extract_strided_slice %12 {offsets = [0, 0], sizes = [8, 32], strides = [1, 1]} : vector<8x384xbf16> to vector<8x32xbf16>
    %17 = vector.extract_strided_slice %12 {offsets = [0, 128], sizes = [8, 32], strides = [1, 1]} : vector<8x384xbf16> to vector<8x32xbf16>
    %18 = vector.extract_strided_slice %12 {offsets = [0, 256], sizes = [8, 32], strides = [1, 1]} : vector<8x384xbf16> to vector<8x32xbf16>
    %cst_12 = arith.constant dense<0.000000e+00> : vector<8x8xf32>
    %19 = tpu.matmul %16, %17, %cst_12 {dimension_numbers = #tpu.dot_dimension_numbers<[1], [1], [0], [0], [0, 0, 1, 0], [], []>} : vector<8x32xbf16>, vector<8x32xbf16>, vector<8x8xf32> -> vector<8x8xf32>
    %20 = vector.broadcast %14 : vector<1x8xf32> to vector<8x8xf32>
    %21 = arith.addf %19, %20 : vector<8x8xf32>
    %cst_13 = arith.constant dense<0xFF800000> : vector<8xf32>
    %22 = vector.multi_reduction <maximumf>, %21, %cst_13 [1] : vector<8x8xf32> to vector<8xf32>
    %23 = vector.shape_cast %22 : vector<8xf32> to vector<8x1xf32>
    %24 = vector.broadcast %23 : vector<8x1xf32> to vector<8x8xf32>
    %25 = arith.subf %21, %24 : vector<8x8xf32>
    %26 = math.exp %25 : vector<8x8xf32>
    %cst_14 = arith.constant dense<0.000000e+00> : vector<8xf32>
    %27 = vector.multi_reduction <add>, %26, %cst_14 [1] : vector<8x8xf32> to vector<8xf32>
    %28 = vector.shape_cast %27 : vector<8xf32> to vector<8x1xf32>
    %29 = tpu.reciprocal %28 {approx = true} : vector<8x1xf32> -> vector<8x1xf32>
    %30 = vector.broadcast %29 : vector<8x1xf32> to vector<8x8xf32>
    %31 = arith.mulf %26, %30 : vector<8x8xf32>
    %32 = arith.truncf %31 : vector<8x8xf32> to vector<8x8xbf16>
    %cst_15 = arith.constant dense<0.000000e+00> : vector<8x32xf32>
    %33 = tpu.matmul %32, %18, %cst_15 {dimension_numbers = #tpu.dot_dimension_numbers<[1], [0], [0], [1], [0, 0, 1, 1], [], []>} : vector<8x8xbf16>, vector<8x32xbf16>, vector<8x32xf32> -> vector<8x32xf32>
    %34 = arith.truncf %33 : vector<8x32xf32> to vector<8x32xbf16>
    %c0_16 = arith.constant 0 : index
    %c0_17 = arith.constant 0 : index
    %c0_18 = arith.constant 0 : index
    %35 = vector.load %arg8[%c0_16, %c0_17, %c0_18] : memref<1x128x128xbf16, #tpu.memory_space<vmem>>, vector<1x32x128xbf16>
    %36 = vector.shape_cast %35 : vector<1x32x128xbf16> to vector<32x128xbf16>
    %cst_19 = arith.constant dense<0.000000e+00> : vector<8x128xf32>
    %37 = tpu.matmul %34, %36, %cst_19 {dimension_numbers = #tpu.dot_dimension_numbers<[1], [0], [0], [1], [0, 0, 1, 1], [], []>} : vector<8x32xbf16>, vector<32x128xbf16>, vector<8x128xf32> -> vector<8x128xf32>
    %38 = arith.addf %15, %37 : vector<8x128xf32>
    %39 = vector.extract_strided_slice %12 {offsets = [0, 32], sizes = [8, 32], strides = [1, 1]} : vector<8x384xbf16> to vector<8x32xbf16>
    %40 = vector.extract_strided_slice %12 {offsets = [0, 160], sizes = [8, 32], strides = [1, 1]} : vector<8x384xbf16> to vector<8x32xbf16>
    %41 = vector.extract_strided_slice %12 {offsets = [0, 288], sizes = [8, 32], strides = [1, 1]} : vector<8x384xbf16> to vector<8x32xbf16>
    %cst_20 = arith.constant dense<0.000000e+00> : vector<8x8xf32>
    %42 = tpu.matmul %39, %40, %cst_20 {dimension_numbers = #tpu.dot_dimension_numbers<[1], [1], [0], [0], [0, 0, 1, 0], [], []>} : vector<8x32xbf16>, vector<8x32xbf16>, vector<8x8xf32> -> vector<8x8xf32>
    %43 = vector.broadcast %14 : vector<1x8xf32> to vector<8x8xf32>
    %44 = arith.addf %42, %43 : vector<8x8xf32>
    %cst_21 = arith.constant dense<0xFF800000> : vector<8xf32>
    %45 = vector.multi_reduction <maximumf>, %44, %cst_21 [1] : vector<8x8xf32> to vector<8xf32>
    %46 = vector.shape_cast %45 : vector<8xf32> to vector<8x1xf32>
    %47 = vector.broadcast %46 : vector<8x1xf32> to vector<8x8xf32>
    %48 = arith.subf %44, %47 : vector<8x8xf32>
    %49 = math.exp %48 : vector<8x8xf32>
    %cst_22 = arith.constant dense<0.000000e+00> : vector<8xf32>
    %50 = vector.multi_reduction <add>, %49, %cst_22 [1] : vector<8x8xf32> to vector<8xf32>
    %51 = vector.shape_cast %50 : vector<8xf32> to vector<8x1xf32>
    %52 = tpu.reciprocal %51 {approx = true} : vector<8x1xf32> -> vector<8x1xf32>
    %53 = vector.broadcast %52 : vector<8x1xf32> to vector<8x8xf32>
    %54 = arith.mulf %49, %53 : vector<8x8xf32>
    %55 = arith.truncf %54 : vector<8x8xf32> to vector<8x8xbf16>
    %cst_23 = arith.constant dense<0.000000e+00> : vector<8x32xf32>
    %56 = tpu.matmul %55, %41, %cst_23 {dimension_numbers = #tpu.dot_dimension_numbers<[1], [0], [0], [1], [0, 0, 1, 1], [], []>} : vector<8x8xbf16>, vector<8x32xbf16>, vector<8x32xf32> -> vector<8x32xf32>
    %57 = arith.truncf %56 : vector<8x32xf32> to vector<8x32xbf16>
    %c0_24 = arith.constant 0 : index
    %c32 = arith.constant 32 : index
    %c0_25 = arith.constant 0 : index
    %58 = vector.load %arg8[%c0_24, %c32, %c0_25] : memref<1x128x128xbf16, #tpu.memory_space<vmem>>, vector<1x32x128xbf16>
    %59 = vector.shape_cast %58 : vector<1x32x128xbf16> to vector<32x128xbf16>
    %cst_26 = arith.constant dense<0.000000e+00> : vector<8x128xf32>
    %60 = tpu.matmul %57, %59, %cst_26 {dimension_numbers = #tpu.dot_dimension_numbers<[1], [0], [0], [1], [0, 0, 1, 1], [], []>} : vector<8x32xbf16>, vector<32x128xbf16>, vector<8x128xf32> -> vector<8x128xf32>
    %61 = arith.addf %38, %60 : vector<8x128xf32>
    %62 = vector.extract_strided_slice %12 {offsets = [0, 64], sizes = [8, 32], strides = [1, 1]} : vector<8x384xbf16> to vector<8x32xbf16>
    %63 = vector.extract_strided_slice %12 {offsets = [0, 192], sizes = [8, 32], strides = [1, 1]} : vector<8x384xbf16> to vector<8x32xbf16>
    %64 = vector.extract_strided_slice %12 {offsets = [0, 320], sizes = [8, 32], strides = [1, 1]} : vector<8x384xbf16> to vector<8x32xbf16>
    %cst_27 = arith.constant dense<0.000000e+00> : vector<8x8xf32>
    %65 = tpu.matmul %62, %63, %cst_27 {dimension_numbers = #tpu.dot_dimension_numbers<[1], [1], [0], [0], [0, 0, 1, 0], [], []>} : vector<8x32xbf16>, vector<8x32xbf16>, vector<8x8xf32> -> vector<8x8xf32>
    %66 = vector.broadcast %14 : vector<1x8xf32> to vector<8x8xf32>
    %67 = arith.addf %65, %66 : vector<8x8xf32>
    %cst_28 = arith.constant dense<0xFF800000> : vector<8xf32>
    %68 = vector.multi_reduction <maximumf>, %67, %cst_28 [1] : vector<8x8xf32> to vector<8xf32>
    %69 = vector.shape_cast %68 : vector<8xf32> to vector<8x1xf32>
    %70 = vector.broadcast %69 : vector<8x1xf32> to vector<8x8xf32>
    %71 = arith.subf %67, %70 : vector<8x8xf32>
    %72 = math.exp %71 : vector<8x8xf32>
    %cst_29 = arith.constant dense<0.000000e+00> : vector<8xf32>
    %73 = vector.multi_reduction <add>, %72, %cst_29 [1] : vector<8x8xf32> to vector<8xf32>
    %74 = vector.shape_cast %73 : vector<8xf32> to vector<8x1xf32>
    %75 = tpu.reciprocal %74 {approx = true} : vector<8x1xf32> -> vector<8x1xf32>
    %76 = vector.broadcast %75 : vector<8x1xf32> to vector<8x8xf32>
    %77 = arith.mulf %72, %76 : vector<8x8xf32>
    %78 = arith.truncf %77 : vector<8x8xf32> to vector<8x8xbf16>
    %cst_30 = arith.constant dense<0.000000e+00> : vector<8x32xf32>
    %79 = tpu.matmul %78, %64, %cst_30 {dimension_numbers = #tpu.dot_dimension_numbers<[1], [0], [0], [1], [0, 0, 1, 1], [], []>} : vector<8x8xbf16>, vector<8x32xbf16>, vector<8x32xf32> -> vector<8x32xf32>
    %80 = arith.truncf %79 : vector<8x32xf32> to vector<8x32xbf16>
    %c0_31 = arith.constant 0 : index
    %c64 = arith.constant 64 : index
    %c0_32 = arith.constant 0 : index
    %81 = vector.load %arg8[%c0_31, %c64, %c0_32] : memref<1x128x128xbf16, #tpu.memory_space<vmem>>, vector<1x32x128xbf16>
    %82 = vector.shape_cast %81 : vector<1x32x128xbf16> to vector<32x128xbf16>
    %cst_33 = arith.constant dense<0.000000e+00> : vector<8x128xf32>
    %83 = tpu.matmul %80, %82, %cst_33 {dimension_numbers = #tpu.dot_dimension_numbers<[1], [0], [0], [1], [0, 0, 1, 1], [], []>} : vector<8x32xbf16>, vector<32x128xbf16>, vector<8x128xf32> -> vector<8x128xf32>
    %84 = arith.addf %61, %83 : vector<8x128xf32>
    %85 = vector.extract_strided_slice %12 {offsets = [0, 96], sizes = [8, 32], strides = [1, 1]} : vector<8x384xbf16> to vector<8x32xbf16>
    %86 = vector.extract_strided_slice %12 {offsets = [0, 224], sizes = [8, 32], strides = [1, 1]} : vector<8x384xbf16> to vector<8x32xbf16>
    %87 = vector.extract_strided_slice %12 {offsets = [0, 352], sizes = [8, 32], strides = [1, 1]} : vector<8x384xbf16> to vector<8x32xbf16>
    %cst_34 = arith.constant dense<0.000000e+00> : vector<8x8xf32>
    %88 = tpu.matmul %85, %86, %cst_34 {dimension_numbers = #tpu.dot_dimension_numbers<[1], [1], [0], [0], [0, 0, 1, 0], [], []>} : vector<8x32xbf16>, vector<8x32xbf16>, vector<8x8xf32> -> vector<8x8xf32>
    %89 = vector.broadcast %14 : vector<1x8xf32> to vector<8x8xf32>
    %90 = arith.addf %88, %89 : vector<8x8xf32>
    %cst_35 = arith.constant dense<0xFF800000> : vector<8xf32>
    %91 = vector.multi_reduction <maximumf>, %90, %cst_35 [1] : vector<8x8xf32> to vector<8xf32>
    %92 = vector.shape_cast %91 : vector<8xf32> to vector<8x1xf32>
    %93 = vector.broadcast %92 : vector<8x1xf32> to vector<8x8xf32>
    %94 = arith.subf %90, %93 : vector<8x8xf32>
    %95 = math.exp %94 : vector<8x8xf32>
    %cst_36 = arith.constant dense<0.000000e+00> : vector<8xf32>
    %96 = vector.multi_reduction <add>, %95, %cst_36 [1] : vector<8x8xf32> to vector<8xf32>
    %97 = vector.shape_cast %96 : vector<8xf32> to vector<8x1xf32>
    %98 = tpu.reciprocal %97 {approx = true} : vector<8x1xf32> -> vector<8x1xf32>
    %99 = vector.broadcast %98 : vector<8x1xf32> to vector<8x8xf32>
    %100 = arith.mulf %95, %99 : vector<8x8xf32>
    %101 = arith.truncf %100 : vector<8x8xf32> to vector<8x8xbf16>
    %cst_37 = arith.constant dense<0.000000e+00> : vector<8x32xf32>
    %102 = tpu.matmul %101, %87, %cst_37 {dimension_numbers = #tpu.dot_dimension_numbers<[1], [0], [0], [1], [0, 0, 1, 1], [], []>} : vector<8x8xbf16>, vector<8x32xbf16>, vector<8x32xf32> -> vector<8x32xf32>
    %103 = arith.truncf %102 : vector<8x32xf32> to vector<8x32xbf16>
    %c0_38 = arith.constant 0 : index
    %c96 = arith.constant 96 : index
    %c0_39 = arith.constant 0 : index
    %104 = vector.load %arg8[%c0_38, %c96, %c0_39] : memref<1x128x128xbf16, #tpu.memory_space<vmem>>, vector<1x32x128xbf16>
    %105 = vector.shape_cast %104 : vector<1x32x128xbf16> to vector<32x128xbf16>
    %cst_40 = arith.constant dense<0.000000e+00> : vector<8x128xf32>
    %106 = tpu.matmul %103, %105, %cst_40 {dimension_numbers = #tpu.dot_dimension_numbers<[1], [0], [0], [1], [0, 0, 1, 1], [], []>} : vector<8x32xbf16>, vector<32x128xbf16>, vector<8x128xf32> -> vector<8x128xf32>
    %107 = arith.addf %84, %106 : vector<8x128xf32>
    %c0_41 = arith.constant 0 : index
    %c0_42 = arith.constant 0 : index
    %c0_43 = arith.constant 0 : index
    %108 = vector.load %arg9[%c0_41, %c0_42, %c0_43] : memref<1x1x128xf32, #tpu.memory_space<vmem>>, vector<1x1x128xf32>
    %109 = vector.shape_cast %108 : vector<1x1x128xf32> to vector<1x128xf32>
    %110 = vector.broadcast %109 : vector<1x128xf32> to vector<8x128xf32>
    %111 = arith.addf %107, %110 : vector<8x128xf32>
    %112 = arith.addf %111, %3 : vector<8x128xf32>
    %c0_44 = arith.constant 0 : index
    %c0_45 = arith.constant 0 : index
    %c0_46 = arith.constant 0 : index
    %113 = vector.load %arg10[%c0_44, %c0_45, %c0_46] : memref<1x1x128xf32, #tpu.memory_space<vmem>>, vector<1x1x128xf32>
    %114 = vector.shape_cast %113 : vector<1x1x128xf32> to vector<1x128xf32>
    %c0_47 = arith.constant 0 : index
    %c0_48 = arith.constant 0 : index
    %c0_49 = arith.constant 0 : index
    %115 = vector.load %arg11[%c0_47, %c0_48, %c0_49] : memref<1x1x128xf32, #tpu.memory_space<vmem>>, vector<1x1x128xf32>
    %116 = vector.shape_cast %115 : vector<1x1x128xf32> to vector<1x128xf32>
    %cst_50 = arith.constant dense<0.000000e+00> : vector<8xf32>
    %117 = vector.multi_reduction <add>, %112, %cst_50 [1] : vector<8x128xf32> to vector<8xf32>
    %118 = vector.shape_cast %117 : vector<8xf32> to vector<8x1xf32>
    %cst_51 = arith.constant 1.280000e+02 : f32
    %119 = vector.broadcast %cst_51 : f32 to vector<8x1xf32>
    %120 = arith.divf %118, %119 : vector<8x1xf32>
    %121 = vector.broadcast %120 : vector<8x1xf32> to vector<8x128xf32>
    %122 = arith.subf %112, %121 : vector<8x128xf32>
    %123 = arith.mulf %122, %122 : vector<8x128xf32>
    %cst_52 = arith.constant dense<0.000000e+00> : vector<8xf32>
    %124 = vector.multi_reduction <add>, %123, %cst_52 [1] : vector<8x128xf32> to vector<8xf32>
    %125 = vector.shape_cast %124 : vector<8xf32> to vector<8x1xf32>
    %cst_53 = arith.constant 1.280000e+02 : f32
    %126 = vector.broadcast %cst_53 : f32 to vector<8x1xf32>
    %127 = arith.divf %125, %126 : vector<8x1xf32>
    %128 = vector.broadcast %120 : vector<8x1xf32> to vector<8x128xf32>
    %129 = arith.subf %112, %128 : vector<8x128xf32>
    %cst_54 = arith.constant 9.99999996E-13 : f32
    %130 = vector.broadcast %cst_54 : f32 to vector<8x1xf32>
    %131 = arith.addf %127, %130 : vector<8x1xf32>
    %132 = math.rsqrt %131 : vector<8x1xf32>
    %133 = vector.broadcast %132 : vector<8x1xf32> to vector<8x128xf32>
    %134 = arith.mulf %129, %133 : vector<8x128xf32>
    %135 = vector.broadcast %114 : vector<1x128xf32> to vector<8x128xf32>
    %136 = arith.mulf %134, %135 : vector<8x128xf32>
    %137 = vector.broadcast %116 : vector<1x128xf32> to vector<8x128xf32>
    %138 = arith.addf %136, %137 : vector<8x128xf32>
    %139 = arith.truncf %138 : vector<8x128xf32> to vector<8x128xbf16>
    %c0_55 = arith.constant 0 : index
    %c0_56 = arith.constant 0 : index
    %c0_57 = arith.constant 0 : index
    %140 = vector.load %arg12[%c0_55, %c0_56, %c0_57] : memref<1x128x256xbf16, #tpu.memory_space<vmem>>, vector<1x128x256xbf16>
    %141 = vector.shape_cast %140 : vector<1x128x256xbf16> to vector<128x256xbf16>
    %cst_58 = arith.constant dense<0.000000e+00> : vector<8x256xf32>
    %142 = tpu.matmul %139, %141, %cst_58 {dimension_numbers = #tpu.dot_dimension_numbers<[1], [0], [0], [1], [0, 0, 1, 1], [], []>} : vector<8x128xbf16>, vector<128x256xbf16>, vector<8x256xf32> -> vector<8x256xf32>
    %c0_59 = arith.constant 0 : index
    %c0_60 = arith.constant 0 : index
    %c0_61 = arith.constant 0 : index
    %143 = vector.load %arg13[%c0_59, %c0_60, %c0_61] : memref<1x1x256xf32, #tpu.memory_space<vmem>>, vector<1x1x256xf32>
    %144 = vector.shape_cast %143 : vector<1x1x256xf32> to vector<1x256xf32>
    %145 = vector.broadcast %144 : vector<1x256xf32> to vector<8x256xf32>
    %146 = arith.addf %142, %145 : vector<8x256xf32>
    %147 = arith.mulf %146, %146 : vector<8x256xf32>
    %148 = arith.mulf %146, %147 : vector<8x256xf32>
    %cst_62 = arith.constant 4.471500e-02 : f32
    %149 = vector.broadcast %cst_62 : f32 to vector<8x256xf32>
    %150 = arith.mulf %149, %148 : vector<8x256xf32>
    %151 = arith.addf %146, %150 : vector<8x256xf32>
    %cst_63 = arith.constant 0.797884583 : f32
    %152 = vector.broadcast %cst_63 : f32 to vector<8x256xf32>
    %153 = arith.mulf %152, %151 : vector<8x256xf32>
    %154 = math.tanh %153 : vector<8x256xf32>
    %cst_64 = arith.constant 1.000000e+00 : f32
    %155 = vector.broadcast %cst_64 : f32 to vector<8x256xf32>
    %156 = arith.addf %155, %154 : vector<8x256xf32>
    %cst_65 = arith.constant 5.000000e-01 : f32
    %157 = vector.broadcast %cst_65 : f32 to vector<8x256xf32>
    %158 = arith.mulf %157, %156 : vector<8x256xf32>
    %159 = arith.mulf %146, %158 : vector<8x256xf32>
    %160 = arith.truncf %159 : vector<8x256xf32> to vector<8x256xbf16>
    %c0_66 = arith.constant 0 : index
    %c0_67 = arith.constant 0 : index
    %c0_68 = arith.constant 0 : index
    %161 = vector.load %arg14[%c0_66, %c0_67, %c0_68] : memref<1x256x128xbf16, #tpu.memory_space<vmem>>, vector<1x256x128xbf16>
    %162 = vector.shape_cast %161 : vector<1x256x128xbf16> to vector<256x128xbf16>
    %cst_69 = arith.constant dense<0.000000e+00> : vector<8x128xf32>
    %163 = tpu.matmul %160, %162, %cst_69 {dimension_numbers = #tpu.dot_dimension_numbers<[1], [0], [0], [1], [0, 0, 1, 1], [], []>} : vector<8x256xbf16>, vector<256x128xbf16>, vector<8x128xf32> -> vector<8x128xf32>
    %c0_70 = arith.constant 0 : index
    %c0_71 = arith.constant 0 : index
    %c0_72 = arith.constant 0 : index
    %164 = vector.load %arg15[%c0_70, %c0_71, %c0_72] : memref<1x1x128xf32, #tpu.memory_space<vmem>>, vector<1x1x128xf32>
    %165 = vector.shape_cast %164 : vector<1x1x128xf32> to vector<1x128xf32>
    %166 = vector.broadcast %165 : vector<1x128xf32> to vector<8x128xf32>
    %167 = arith.addf %163, %166 : vector<8x128xf32>
    %168 = arith.addf %167, %138 : vector<8x128xf32>
    %c0_73 = arith.constant 0 : index
    %c0_74 = arith.constant 0 : index
    %c0_75 = arith.constant 0 : index
    %169 = vector.load %arg16[%c0_73, %c0_74, %c0_75] : memref<1x1x128xf32, #tpu.memory_space<vmem>>, vector<1x1x128xf32>
    %170 = vector.shape_cast %169 : vector<1x1x128xf32> to vector<1x128xf32>
    %c0_76 = arith.constant 0 : index
    %c0_77 = arith.constant 0 : index
    %c0_78 = arith.constant 0 : index
    %171 = vector.load %arg17[%c0_76, %c0_77, %c0_78] : memref<1x1x128xf32, #tpu.memory_space<vmem>>, vector<1x1x128xf32>
    %172 = vector.shape_cast %171 : vector<1x1x128xf32> to vector<1x128xf32>
    %cst_79 = arith.constant dense<0.000000e+00> : vector<8xf32>
    %173 = vector.multi_reduction <add>, %168, %cst_79 [1] : vector<8x128xf32> to vector<8xf32>
    %174 = vector.shape_cast %173 : vector<8xf32> to vector<8x1xf32>
    %cst_80 = arith.constant 1.280000e+02 : f32
    %175 = vector.broadcast %cst_80 : f32 to vector<8x1xf32>
    %176 = arith.divf %174, %175 : vector<8x1xf32>
    %177 = vector.broadcast %176 : vector<8x1xf32> to vector<8x128xf32>
    %178 = arith.subf %168, %177 : vector<8x128xf32>
    %179 = arith.mulf %178, %178 : vector<8x128xf32>
    %cst_81 = arith.constant dense<0.000000e+00> : vector<8xf32>
    %180 = vector.multi_reduction <add>, %179, %cst_81 [1] : vector<8x128xf32> to vector<8xf32>
    %181 = vector.shape_cast %180 : vector<8xf32> to vector<8x1xf32>
    %cst_82 = arith.constant 1.280000e+02 : f32
    %182 = vector.broadcast %cst_82 : f32 to vector<8x1xf32>
    %183 = arith.divf %181, %182 : vector<8x1xf32>
    %184 = vector.broadcast %176 : vector<8x1xf32> to vector<8x128xf32>
    %185 = arith.subf %168, %184 : vector<8x128xf32>
    %cst_83 = arith.constant 9.99999996E-13 : f32
    %186 = vector.broadcast %cst_83 : f32 to vector<8x1xf32>
    %187 = arith.addf %183, %186 : vector<8x1xf32>
    %188 = math.rsqrt %187 : vector<8x1xf32>
    %189 = vector.broadcast %188 : vector<8x1xf32> to vector<8x128xf32>
    %190 = arith.mulf %185, %189 : vector<8x128xf32>
    %191 = vector.broadcast %170 : vector<1x128xf32> to vector<8x128xf32>
    %192 = arith.mulf %190, %191 : vector<8x128xf32>
    %193 = vector.broadcast %172 : vector<1x128xf32> to vector<8x128xf32>
    %194 = arith.addf %192, %193 : vector<8x128xf32>
    %c0_84 = arith.constant 0 : index
    %c0_85 = arith.constant 0 : index
    %195 = vector.load %arg19[%c0_84, %c0_85] : memref<8x128xf32, #tpu.memory_space<vmem>>, vector<8x128xf32>
    tpu.vector_store %arg19[%c0_84, %c0_85], %194 {strides = array<i32>} : memref<8x128xf32, #tpu.memory_space<vmem>>, vector<8x128xf32>,
    %c1_i32 = arith.constant 1 : i32
    %196 = arith.cmpi eq, %arg1, %c1_i32 : i32
    %197 = arith.extui %196 : i1 to i32
    %c0_i32_86 = arith.constant 0 : i32
    %198 = arith.cmpi ne, %197, %c0_i32_86 : i32
    scf.if %198 {
      %199 = vector.extract_strided_slice %194 {offsets = [0, 0], sizes = [1, 128], strides = [1, 1]} : vector<8x128xf32> to vector<1x128xf32>
      %c0_87 = arith.constant 0 : index
      %c0_88 = arith.constant 0 : index
      %c0_89 = arith.constant 0 : index
      %200 = vector.load %arg18[%c0_87, %c0_88, %c0_89] : memref<1x1x128xf32, #tpu.memory_space<vmem>>, vector<1x1x128xf32>
      %201 = vector.shape_cast %200 : vector<1x1x128xf32> to vector<1x128xf32>
      %202 = vector.shape_cast %199 : vector<1x128xf32> to vector<1x1x128xf32>
      tpu.vector_store %arg18[%c0_87, %c0_88, %c0_89], %202 {strides = array<i32>} : memref<1x1x128xf32, #tpu.memory_space<vmem>>, vector<1x1x128xf32>,
    } else {
    }
    return
  }
  func.func @transform_0(%arg0: i32, %arg1: i32) -> (i32, i32, i32) {
    %c0_i32 = arith.constant 0 : i32
    %c0_i32_0 = arith.constant 0 : i32
    %c0_i32_1 = arith.constant 0 : i32
    return %arg0, %c0_i32, %c0_i32_0 : i32, i32, i32
  }
  func.func @transform_1(%arg0: i32, %arg1: i32) -> (i32, i32) {
    %c0_i32 = arith.constant 0 : i32
    %c0_i32_0 = arith.constant 0 : i32
    %c0_i32_1 = arith.constant 0 : i32
    return %c0_i32, %c0_i32_0 : i32, i32
  }
  func.func @transform_2(%arg0: i32, %arg1: i32) -> (i32, i32) {
    %c0_i32 = arith.constant 0 : i32
    %c0_i32_0 = arith.constant 0 : i32
    %c0_i32_1 = arith.constant 0 : i32
    return %c0_i32, %c0_i32_0 : i32, i32
  }
  func.func @transform_3(%arg0: i32, %arg1: i32) -> (i32, i32, i32) {
    %c0_i32 = arith.constant 0 : i32
    %c0_i32_0 = arith.constant 0 : i32
    %c0_i32_1 = arith.constant 0 : i32
    return %arg0, %c0_i32, %c0_i32_0 : i32, i32, i32
  }
  func.func @transform_4(%arg0: i32, %arg1: i32) -> (i32, i32, i32) {
    %c0_i32 = arith.constant 0 : i32
    %c0_i32_0 = arith.constant 0 : i32
    %c0_i32_1 = arith.constant 0 : i32
    return %arg1, %c0_i32, %c0_i32_0 : i32, i32, i32
  }
  func.func @transform_5(%arg0: i32, %arg1: i32) -> (i32, i32, i32) {
    %c0_i32 = arith.constant 0 : i32
    %c0_i32_0 = arith.constant 0 : i32
    %c0_i32_1 = arith.constant 0 : i32
    return %arg1, %c0_i32, %c0_i32_0 : i32, i32, i32
  }
  func.func @transform_6(%arg0: i32, %arg1: i32) -> (i32, i32, i32) {
    %c0_i32 = arith.constant 0 : i32
    %c0_i32_0 = arith.constant 0 : i32
    %c0_i32_1 = arith.constant 0 : i32
    return %arg1, %c0_i32, %c0_i32_0 : i32, i32, i32
  }
  func.func @transform_7(%arg0: i32, %arg1: i32) -> (i32, i32, i32) {
    %c0_i32 = arith.constant 0 : i32
    %c0_i32_0 = arith.constant 0 : i32
    %c0_i32_1 = arith.constant 0 : i32
    return %arg1, %c0_i32, %c0_i32_0 : i32, i32, i32
  }
  func.func @transform_8(%arg0: i32, %arg1: i32) -> (i32, i32, i32) {
    %c0_i32 = arith.constant 0 : i32
    %c0_i32_0 = arith.constant 0 : i32
    %c0_i32_1 = arith.constant 0 : i32
    return %arg1, %c0_i32, %c0_i32_0 : i32, i32, i32
  }
  func.func @transform_9(%arg0: i32, %arg1: i32) -> (i32, i32, i32) {
    %c0_i32 = arith.constant 0 : i32
    %c0_i32_0 = arith.constant 0 : i32
    %c0_i32_1 = arith.constant 0 : i32
    return %arg1, %c0_i32, %c0_i32_0 : i32, i32, i32
  }
  func.func @transform_10(%arg0: i32, %arg1: i32) -> (i32, i32, i32) {
    %c0_i32 = arith.constant 0 : i32
    %c0_i32_0 = arith.constant 0 : i32
    %c0_i32_1 = arith.constant 0 : i32
    return %arg1, %c0_i32, %c0_i32_0 : i32, i32, i32
  }
  func.func @transform_11(%arg0: i32, %arg1: i32) -> (i32, i32, i32) {
    %c0_i32 = arith.constant 0 : i32
    %c0_i32_0 = arith.constant 0 : i32
    %c0_i32_1 = arith.constant 0 : i32
    return %arg1, %c0_i32, %c0_i32_0 : i32, i32, i32
  }
  func.func @transform_12(%arg0: i32, %arg1: i32) -> (i32, i32, i32) {
    %c0_i32 = arith.constant 0 : i32
    %c0_i32_0 = arith.constant 0 : i32
    %c0_i32_1 = arith.constant 0 : i32
    return %arg1, %c0_i32, %c0_i32_0 : i32, i32, i32
  }
  func.func @transform_13(%arg0: i32, %arg1: i32) -> (i32, i32, i32) {
    %c0_i32 = arith.constant 0 : i32
    %c0_i32_0 = arith.constant 0 : i32
    %c0_i32_1 = arith.constant 0 : i32
    return %arg1, %c0_i32, %c0_i32_0 : i32, i32, i32
  }
  func.func @transform_14(%arg0: i32, %arg1: i32) -> (i32, i32, i32) {
    %c0_i32 = arith.constant 0 : i32
    %c0_i32_0 = arith.constant 0 : i32
    %c0_i32_1 = arith.constant 0 : i32
    return %arg1, %c0_i32, %c0_i32_0 : i32, i32, i32
  }
  func.func @transform_15(%arg0: i32, %arg1: i32) -> (i32, i32, i32) {
    %c0_i32 = arith.constant 0 : i32
    %c0_i32_0 = arith.constant 0 : i32
    %c0_i32_1 = arith.constant 0 : i32
    return %arg1, %c0_i32, %c0_i32_0 : i32, i32, i32
  }
  func.func @transform_16(%arg0: i32, %arg1: i32) -> (i32, i32, i32) {
    %c0_i32 = arith.constant 0 : i32
    %c0_i32_0 = arith.constant 0 : i32
    %c0_i32_1 = arith.constant 0 : i32
    return %arg0, %c0_i32, %c0_i32_0 : i32, i32, i32
  }
}

</mosaic_0001>

<bundles_post_ra>
// kernel: demand_task_forward.1
= control target key start
LH: loop header
LB: loop body
LE: loop exit
PB: predicated region body
PF: predicated region fallthrough
CT: control target
= control target key end

     0   :  { %s3298_s0 = inlined_call_operand.vmem [shape: f32[2,8,128], index: 0, kind: input, shape index: {}]   ;;  %s3299_s1 = inlined_call_operand.vmem [shape: f32[1,128], index: 1, kind: input, shape index: {}]   ;;  %s3300_s2 = inlined_call_operand.vmem [shape: f32[1,128], index: 2, kind: input, shape index: {}]   ;;  %s3301_s3 = inlined_call_operand.vmem [shape: f32[2,1,8], index: 3, kind: input, shape index: {}]   ;;  %s3302_s4 = inlined_call_operand.hbm [shape: bf16[2,128,384], index: 4, kind: input, shape index: {}]   ;;  %s3303_s5 = inlined_call_operand.vmem [shape: f32[2,1,384], index: 5, kind: input, shape index: {}]   ;;  %s3304_s6 = inlined_call_operand.vmem [shape: bf16[2,128,128], index: 6, kind: input, shape index: {}]   ;;  %s3305_s7 = inlined_call_operand.vmem [shape: f32[2,1,128], index: 7, kind: input, shape index: {}]   ;;  %s3306_s8 = inlined_call_operand.vmem [shape: f32[2,1,128], index: 8, kind: input, shape index: {}]   ;;  %s3307_s9 = inlined_call_operand.vmem [shape: f32[2,1,128], index: 9, kind: input, shape index: {}]   ;;  %s3308_s10 = inlined_call_operand.vmem [shape: bf16[2,128,256], index: 10, kind: input, shape index: {}]   ;;  %s3309_s11 = inlined_call_operand.vmem [shape: f32[2,1,256], index: 11, kind: input, shape index: {}]   ;;  %s3310_s12 = inlined_call_operand.hbm [shape: bf16[2,256,128], index: 12, kind: input, shape index: {}]   ;;  %s3311_s13 = inlined_call_operand.vmem [shape: f32[2,1,128], index: 13, kind: input, shape index: {}]   ;;  %s3312_s14 = inlined_call_operand.vmem [shape: f32[2,1,128], index: 14, kind: input, shape index: {}]   ;;  %s3313_s15 = inlined_call_operand.vmem [shape: f32[2,1,128], index: 15, kind: input, shape index: {}]   ;;  %s3314_s16 = inlined_call_operand.hbm [shape: f32[2,1,128], index: 16, kind: output, shape index: {}]  }
   0x1   :  { %3331 = sst [smem:[#allocation27_spill]] %s3298_s0 }
   0x2   :  { %3332 = sst [smem:[#allocation28_spill]] %s3299_s1 }
   0x3   :  { %3333 = sst [smem:[#allocation29_spill]] %s3300_s2 }
   0x4   :  { %3334 = sst [smem:[#allocation30_spill]] %s3302_s4 }
   0x5   :  { %3335 = sst [smem:[#allocation31_spill]] %s3303_s5 }
   0x6   :  { %3336 = sst [smem:[#allocation32_spill]] %s3304_s6 }
   0x7   :  { %3337 = sst [smem:[#allocation33_spill]] %s3305_s7 }
   0x8   :  { %3338 = sst [smem:[#allocation34_spill]] %s3306_s8 }
   0x9   :  { %3339 = sst [smem:[#allocation35_spill]] %s3307_s9 }
   0xa   :  { %3340 = sst [smem:[#allocation36_spill]] %s3308_s10 }
   0xb   :  { %3341 = sst [smem:[#allocation37_spill]] %s3309_s11 }
   0xc   :  { %3342 = sst [smem:[#allocation38_spill]] %s3310_s12 }
   0xd   :  { %3343 = sst [smem:[#allocation39_spill]] %s3311_s13 }
   0xe   :  { %3344 = sst [smem:[#allocation40_spill]] %s3312_s14 }
   0xf   :  { %3345 = sst [smem:[#allocation41_spill]] %s3313_s15 }
  0x10   :  { %3346 = sst [smem:[#allocation42_spill]] %s3314_s16 }
  0x11   :  { %21 = vsyncpa [#allocation4], 0 }
  0x12   :  { %23 = vsyncpa [#allocation4 + $0x1], 0 }
  0x13   :  { %24 = vsyncpa [#allocation7], 0 }
  0x14   :  { %26 = vsyncpa [#allocation7 + $0x1], 0 }
  0x15   :  { %27 = vsyncpa [#allocation5], 0 }
  0x16   :  { %29 = vsyncpa [#allocation5 + $0x1], 0  ;;  %s2825_s21 = smov 0   ;;  %s2827_s22 = smov 0  }
  0x17   :  { %s2829_s23 = smov 0   ;;  %s2831_s24 = smov 0  }
  0x18   :  { %s2833_s25 = smov 0   ;;  %s2835_s26 = smov 0  }
  0x19   :  { %s2837_s27 = smov 0   ;;  %s2839_s28 = smov 0  }
  0x1a   :  { %s2841_s29 = smov 0   ;;  %s2843_s30 = smov 0  }
  0x1b   :  { %s2845_s0 = smov 0  }
  0x1c LB: > { %3347 = sst [smem:[#allocation12_spill]] %s2689_s21  ;;  %s2029_s17 = sadd.s32 4294967295, %s2729_s0   ;;  %s2729_s0 = sphi %s2845_s0, %s35_s0   ;;  %s2725_s30 = sphi %s2843_s30, %s3409_s30   ;;  %s2721_s29 = sphi %s2841_s29, %s3408_s29   ;;  %s2717_s28 = sphi %s2839_s28, %s3407_s28   ;;  %s2713_s27 = sphi %s2837_s27, %s3406_s27   ;;  %s2709_s26 = sphi %s2835_s26, %s3405_s26   ;;  %s2705_s25 = sphi %s2833_s25, %s3404_s25   ;;  %s2701_s24 = sphi %s2831_s24, %s3403_s24   ;;  %s2697_s23 = sphi %s2829_s23, %s3402_s23   ;;  %s2693_s22 = sphi %s2827_s22, %s3411_s22   ;;  %s2689_s21 = sphi %s2825_s21, %s3410_s21  }
  0x1d   : > { %3348 = sst [smem:[#allocation13_spill]] %s2697_s23  ;;  %s2030_s18 = sadd.s32 4294967294, %s2729_s0  }
  0x1e   : > { %3349 = sst [smem:[#allocation14_spill]] %s2705_s25  ;;  %s44_s19 = sadd.s32 1, %s2721_s29 }
  0x1f   : > { %3350 = sst [smem:[#allocation15_spill]] %s2709_s26  ;;  %s47_s20 = sadd.s32 1, %s2725_s30 }
  0x20   : > { %3351 = sst [smem:[#allocation16_spill]] %s2717_s28  ;;  %p45_p0 = scmp.ge.s32.totalorder %s44_s19, 2 }
  0x21   : > { %3352 = sst [smem:[#allocation17_spill]] %s2721_s29  ;;  %s148_s16 = sadd.s32 1, %s2709_s26 }
  0x22   : > { %3353 = sst [smem:[#allocation18_spill]] %s2725_s30  ;;  %p155_p1 = scmp.ne.s32.totalorder %s2709_s26, %s2705_s25 }
  0x23   : > { %3354 = sst [smem:[#allocation19_spill]] %s2729_s0  ;;  %p156_p2 = scmp.eq.s32.totalorder %s2729_s0, 0 }
  0x24   : > { %s3413_s19 = smov (%p45_p0, %s44_s19), 0  ;;  %s3415_s20 = smov (!%p45_p0, %s47_s20), %s2725_s30 }
  0x25   : > { %3355 = sst [smem:[#allocation20_spill]] %s3413_s19  ;;  %s145_s2 = ssub.s32 %s2721_s29, %s3413_s19 }
  0x26   : > { %p2891_p3 = por %p156_p2, %p155_p1  ;;  %p49_p4 = scmp.ge.s32.totalorder %s3415_s20, 2 }
  0x27   : > { %p146_p5 = scmp.eq.s32.totalorder %s145_s2, 0  ;;  %p161_p6 = scmp.ne.s32.totalorder %s2705_s25, %s2701_s24 }
  0x28   : > { %p162_p7 = scmp.eq.s32.totalorder %s2029_s17, 0  ;;  %s3417_s20 = smov (%p49_p4, %s3415_s20), 0 }
  0x29   : > { %3357 = sst [smem:[#allocation21_spill]] %s3417_s20  ;;  %s457_s14 = ssub.s32 %s2725_s30, %s3417_s20 }
  0x2a   : > { %s2899_s15 = scalar_select %p146_p5, %s2709_s26, %s148_s16  }
  0x2b   : > { %p2901_p8 = por %p162_p7, %p161_p6  ;;  %p458_p9 = scmp.eq.s32.totalorder %s457_s14, 0 }
  0x2c   : > { %3358 = sst [smem:[#allocation22_spill]] %s2899_s15  ;;  %s460_s13 = sadd.s32 1, %s2697_s23 }
  0x2d   : > { %p470_p10 = scmp.ne.s32.totalorder %s2697_s23, %s2693_s22  ;;  %p471_p11 = scmp.eq.s32.totalorder %s2029_s17, 3 }
  0x2e   : > { %s2911_s2 = scalar_select %p458_p9, %s2697_s23, %s460_s13  }
  0x2f   : > { %p2913_p12 = por %p471_p11, %p470_p10  ;;  %p476_p13 = scmp.ne.s32.totalorder %s2693_s22, %s2689_s21 }
  0x30   : > { %3360 = sst [smem:[#allocation23_spill]] %s2911_s2  ;;  %p477_p0 = scmp.eq.s32.totalorder %s2030_s18, 3 }
  0x31   : > { %s3361_s24 = scalar_select %p2913_p12, 1, 0 }
  0x32   : > { %p2405_p1 = scmp.lt.s32.totalorder %s2729_s0, 4  ;;  %s2921_s16 = sand.u32 1, %s2709_s26  }
  0x33   : > { %3362 = sst [smem:[#allocation24_spill]] %s3361_s24  ;;  %p2923_p2 = por %p477_p0, %p476_p13 }
  0x34   : > { %s2384_s13 = smul.u32 192, %s2921_s16  ;;  %p2930_p4 = pnand %p2405_p1, %p2891_p3 }
  0x35   : > { %s3363_s14 = scalar_select %p2923_p2, 1, 0 }
  0x36   : > { %s2385_s18 = smul.u32 192, %s2721_s29  ;;  %s3366_s4 = sld [smem:[#allocation30_spill]] }
  0x37   : > { %3364 = sst [smem:[#allocation25_spill]] %s3363_s14  ;;  %s520_s26 = scalar_lea.vmem [#allocation3], %s2384_s13 }
  0x38   : > { %s528_s2 = sshll.u32 %s520_s26, 4  ;;  %s517_s14 = scalar_lea.sflag [#allocation4], %s2921_s16  ;;  %s529_s2 = int_to_ptr.vmem [resolvable:$true] %s528_s2 }
  0x39   : > { %s2731_s21 = smov 192   ;;  %s2732_s1 = smov 12  }
  0x3a   : > { %p2037_p3 = scmp.ge.s32.totalorder %s2729_s0, 1  ;;  %p624_p5 = scmp.lt.s32.totalorder %s2729_s0, 5 }
  0x3b   : > { %s2034_s24 = sshll.u32 %s2921_s16, 7  ;;  %s2317_s11 = sshll.u32 %s2721_s29, 7 }
  0x3c   : > { %s525_s15 = scalar_lea.hbm %s3366_s4, %s2385_s18  ;;  %p625_p6 = pnand %p2037_p3, %p624_p5 }
  0x3d   : > { %s526_s23 = sshll.u32 %s525_s15, 4  ;;  %s590_s10 = scalar_lea.vmem [#allocation6], %s2034_s24  ;;  %s527_s23 = int_to_ptr.hbm [resolvable:$true] %s526_s23 }
  0x3e   : > { %2397 = dma.hbm_to_vmem [thread:$0]  (!%p2930_p4), %s527_s23, 3072, %s529_s2, %s517_s14, %s2731_s21, %s2731_s21, %s2732_s1  }
  0x3f   : > { %s598_s30 = sshll.u32 %s590_s10, 4  ;;  %s3367_s12 = sld [smem:[#allocation38_spill]]  ;;  %s599_s30 = int_to_ptr.vmem [resolvable:$true] %s598_s30 }
  0x40   : > { %s587_s18 = scalar_lea.sflag [#allocation7], %s2921_s16  ;;  %s2733_s4 = smov 64  }
  0x41   : > { %s2734_s9 = smov 4  }
  0x43   : > { %628 = sbr.rel (%p625_p6) target bundleno = 2603 (0xa2b), region = 84 }
  0x45   : > { %s595_s15 = scalar_lea.hbm %s3367_s12, %s2317_s11 }
  0x46   : > { %s596_s26 = sshll.u32 %s595_s15, 4  ;;  %s597_s26 = int_to_ptr.hbm [resolvable:$true] %s596_s26 }
  0x47   : > { %2400 = dma.hbm_to_vmem [thread:$0]  (!%p2930_p4), %s597_s26, 2048, %s599_s30, %s587_s18, %s2733_s4, %s2733_s4, %s2734_s9  }
  0x48   : > { %s630_s21 = sand.u32 1, %s2705_s25  }
  0x49   : > { %s2386_s23 = smul.u32 192, %s630_s21  ;;  %s631_s2 = scalar_lea.sflag [#allocation4], %s630_s21 }
  0x4b   : > { %s2952_s24 = scalar_lea.vmem [#allocation3], %s2386_s23 }
  0x4c   : > { %2676 = dma.done.wait (%p2901_p8), %s631_s2, 3072  }
  0x4d   : > { %2678 = vsyncadd (%p2901_p8), %s631_s2, 4294964224  ;;  %s2038_s10 = sshll.u32 %s630_s21, 7  ;;  %s641_s11 = scalar_lea.sflag [#allocation7], %s630_s21 }
  0x4e   : > { %s2958_s16 = scalar_lea.vmem [#allocation6], %s2038_s10 }
  0x4f   : > { %3368 = sst [smem:[#allocation26_spill]] %s2958_s16 }
  0x50   : > { %2680 = dma.done.wait (%p2901_p8), %s641_s11, 2048  }
  0x51   : > { %2682 = vsyncadd (%p2901_p8), %s641_s11, 4294965248  ;;  %p741_p7 = scmp.lt.s32.totalorder %s2717_s28, 1  ;;  %p748_p9 = scmp.lt.s32.totalorder %s2713_s27, 1 }
  0x52   : > { %s3369_s15 = sld [smem:[#allocation27_spill]]  ;;  %p2045_p8 = scmp.ne.s32.totalorder %s2713_s27, 0 }
  0x53   : > { %s2968_s9 = scalar_select %p741_p7, %s2717_s28, 1 }
  0x54   : > { %s2971_s14 = scalar_select %p748_p9, %s2713_s27, 1 }
  0x55   : > { %s2039_s19 = sshll.u32 %s2968_s9, 3  ;;  %s3371_s5 = sld [smem:[#allocation31_spill]] }
  0x56   : > { %s2387_s18 = smul.u32 3, %s2971_s14  ;;  %s2318_s21 = sshll.u32 %s2971_s14, 6 }
  0x57   : > { %s3372_s6 = sld [smem:[#allocation32_spill]]  ;;  %s2319_s23 = sshll.u32 %s2971_s14, 7 }
  0x58   : > { %s744_s26 = scalar_lea.vmem %s3369_s15, %s2039_s19  ;;  %s2044_s2 = sshll.u32 %s2971_s14, 1 }
  0x59   : > { %s3375_s4 = sld [smem:[#allocation36_spill]]  ;;  %s3380_s28 = sand.u32 1, %s2693_s22  }
  0x5a   : > { %s3376_s29 = sld [smem:[#allocation37_spill]]  ;;  %s3031_s10 = scalar_lea.vmem [#allocation8], %s3380_s28 }
  0x5b   : > { %s2990_s12 = scalar_lea.vmem %s3371_s5, %s2387_s18  ;;  %s3377_s30 = sld [smem:[#allocation39_spill]] }
  0x5c   : > { %s3378_s13 = sld [smem:[#allocation40_spill]] }
  0x5d   : > { %s2995_s1 = scalar_lea.vmem %s3372_s6, %s2318_s21  ;;  %s3379_s16 = sld [smem:[#allocation41_spill]] }
  0x5e   : > { %s3381_s8 = sld [smem:[#allocation28_spill]] (!%p2045_p8) }
  0x5f   : > { %s3010_s18 = scalar_lea.vmem %s3375_s4, %s2319_s23  ;;  %788 = sbr.rel (%p2045_p8) target bundleno = 368 (0x170), region = 96 }
  0x60   : > { %s3015_s21 = scalar_lea.vmem %s3376_s29, %s2044_s2 }
  0x61   : > { %s777_s20 = scalar_lea.vmem %s3377_s30, %s2971_s14 }
  0x62   : > { %s780_s25 = scalar_lea.vmem %s3378_s13, %s2971_s14 }
  0x63   : > { %s783_s7 = scalar_lea.vmem %s3379_s16, %s2971_s14 }
  0x64   : > { %v789_v0 = vld [vmem:[%s744_s26] sm:$0xff]  ;;  %v2735_v1 = vmov 128.0   ;;  %s3382_s26 = sld [smem:[#allocation29_spill]] }
  0x65   : > { %792 = vadd.xlane.f32.xlu0 %v789_v0  ;;  %2506 = vrcp.f32 %v2735_v1  ;;  %v2504_v21 = vld [vmem:[%s3381_s8] ss:$0 sm:$0xff] }
  0x6a   : > { %v2505_v23 = vld [vmem:[%s3382_s26] ss:$0 sm:$0xff] }
  0x6b   : > { %v2507_v2 = vpop.eup %2506 }
  0x6c   : > { %v795_v3 = vmul.f32 128.0, %v2507_v2  ;;  %vm799_vm0 = vweird.f32 %v2507_v2 }
  0x6e   : > { %v796_v4 = vsub.f32 1.0, %v795_v3 }
  0x70   : > { %v797_v5 = vmul.f32 %v2507_v2, %v796_v4 }
  0x72   : > { %v798_v6 = vadd.f32 %v2507_v2, %v797_v5 }
  0x74   : > { %v800_v7 = vsel %vm799_vm0, %v2507_v2, %v798_v6 }
  0xd8   : > { %v793_v8 = vpop.xlane.xlu0 %792 }
  0xd9   : > { %v801_v9 = vmul.f32 %v800_v7, %v793_v8 }
  0xdb   : > { %v802_v10 = vsub.f32 %v789_v0, %v801_v9 }
  0xdd   : > { %v803_v11 = vmul.f32 %v802_v10, %v802_v10 }
  0xdf   : > { %804 = vadd.xlane.f32.xlu0 %v803_v11 }
 0x152   : > { %v805_v12 = vpop.xlane.xlu0 %804 }
 0x153   : > { %v806_v13 = vmul.f32 %v805_v12, %v800_v7 }
 0x155   : > { %v807_v14 = vadd.f32 1e-12, %v806_v13 }
 0x157   : > { %2508 = vrsqrt.f32 %v807_v14  ;;  %vm814_vm2 = vweird.f32 %v807_v14 }
 0x15d   : > { %v2509_v15 = vpop.eup %2508 }
 0x15e   : > { %v809_v16 = vmul.f32 %v2509_v15, %v807_v14  ;;  %vm815_vm1 = vweird.f32 %v2509_v15 }
 0x15f   : > { %vm816_vm3 = vmor %vm814_vm2, %vm815_vm1 }
 0x160   : > { %v810_v17 = vmul.f32 %v2509_v15, %v809_v16 }
 0x162   : > { %v811_v18 = vmul.f32 0.5, %v810_v17 }
 0x164   : > { %v812_v19 = vsub.f32 1.5, %v811_v18 }
 0x166   : > { %v813_v20 = vmul.f32 %v2509_v15, %v812_v19 }
 0x168   : > { %v817_v22 = vsel %vm816_vm3, %v2509_v15, %v813_v20 }
 0x169   : > { %v818_v24 = vmul.f32 %v817_v22, %v802_v10 }
 0x16b   : > { %v822_v25 = vmul.f32 %v2504_v21, %v818_v24 }
 0x16d   : > { %v826_v26 = vadd.f32 %v2505_v23, %v822_v25 }
 0x16f   : > { %827 = vst [vmem:[#allocation2] sm:$0xff] %v826_v26 }
 0x170 PF: > { %v2132_v27 = vld [vmem:[%s2952_s24 + $0xa8] sm:$0xf]  ;;  %v2342_v28 = vld [vmem:[%s2952_s24 + $0xb0] sm:$0xf0]  ;;  %v2341_v29 = vld [vmem:[%s2952_s24 + $0xac] sm:$0xf]  ;;  %s3383_s4 = scalar_lea.vmem %s3301_s3, %s2968_s9 }
 0x171   : > { %v2133_v30 = vor.u32 %v2342_v28, %v2132_v27  ;;  %v2134_v31 = vld [vmem:[%s2952_s24 + $0xb4] sm:$0xf0]  ;;  %v2120_v32 = vld [vmem:[%s2952_s24 + $0x90] sm:$0xf]  ;;  %v2339_v33 = vld [vmem:[%s2952_s24 + $0x98] sm:$0xf0] }
 0x172   : > { %v2137_v34 = vor.u32 %v2341_v29, %v2134_v31  ;;  %v2338_v35 = vld [vmem:[%s2952_s24 + $0x94] sm:$0xf]  ;;  %v2122_v36 = vld [vmem:[%s2952_s24 + $0x9c] sm:$0xf0]  ;;  %v2121_v37 = vor.u32 %v2339_v33, %v2120_v32  ;;  %v2108_v39 = vld [vmem:[%s2952_s24 + $0x78] sm:$0xf] }
 0x173   : > { %998 = vmatpush.bf16.msra.mxu0 %v2133_v30  ;;  %v2125_v38 = vor.u32 %v2338_v35, %v2122_v36  ;;  %v2336_v40 = vld [vmem:[%s2952_s24 + $0x80] sm:$0xf0]  ;;  %v2335_v41 = vld [vmem:[%s2952_s24 + $0x7c] sm:$0xf]  ;;  %v2110_v42 = vld [vmem:[%s2952_s24 + $0x84] sm:$0xf0] }
 0x174   : > { %1011 = vmatpush.bf16.msra.mxu1 %v2137_v34  ;;  %v2109_v43 = vor.u32 %v2336_v40, %v2108_v39  ;;  %v2113_v44 = vor.u32 %v2335_v41, %v2110_v42  ;;  %v2096_v45 = vld [vmem:[%s2952_s24 + $0x60] sm:$0xf]  ;;  %v2333_v46 = vld [vmem:[%s2952_s24 + $0x68] sm:$0xf0]  ;;  %v2332_v47 = vld [vmem:[%s2952_s24 + $0x64] sm:$0xf] }
 0x175   : > { %v2098_v48 = vld [vmem:[%s2952_s24 + $0x6c] sm:$0xf0]  ;;  %v2097_v49 = vor.u32 %v2333_v46, %v2096_v45  ;;  %v2343_v51 = vld [vmem:[%s2952_s24 + $0xb8] sm:$0xf0]  ;;  %v2128_v52 = vld [vmem:[%s2952_s24 + $0x98] sm:$0xf] }
 0x176   : > { %v2140_v50 = vld [vmem:[%s2952_s24 + $0xb0] sm:$0xf]  ;;  %v2101_v53 = vor.u32 %v2332_v47, %v2098_v48  ;;  %v2084_v54 = vld [vmem:[%s2952_s24 + $0x48] sm:$0xf]  ;;  %v2330_v55 = vld [vmem:[%s2952_s24 + $0x50] sm:$0xf0] }
 0x177   : > { %999 = vmatpush.bf16.msra.mxu0 %v2121_v37  ;;  %v2141_v56 = vor.u32 %v2343_v51, %v2140_v50  ;;  %v2340_v57 = vld [vmem:[%s2952_s24 + $0xa0] sm:$0xf0]  ;;  %v2329_v58 = vld [vmem:[%s2952_s24 + $0x4c] sm:$0xf]  ;;  %v2086_v59 = vld [vmem:[%s2952_s24 + $0x54] sm:$0xf0]  ;;  %v2085_v61 = vor.u32 %v2330_v55, %v2084_v54 }
 0x178   : > { %1012 = vmatpush.bf16.msra.mxu1 %v2125_v38  ;;  %v2129_v60 = vor.u32 %v2340_v57, %v2128_v52  ;;  %v2072_v62 = vld [vmem:[%s2952_s24 + $0x30] sm:$0xf]  ;;  %v2116_v63 = vld [vmem:[%s2952_s24 + $0x80] sm:$0xf]  ;;  %v2337_v0 = vld [vmem:[%s2952_s24 + $0x88] sm:$0xf0]  ;;  %v2089_v1 = vor.u32 %v2329_v58, %v2086_v59 }
 0x179   : > { %1024 = vmatpush.bf16.msra.mxu2 %v2141_v56  ;;  %v2327_v2 = vld [vmem:[%s2952_s24 + $0x38] sm:$0xf0]  ;;  %v2326_v3 = vld [vmem:[%s2952_s24 + $0x34] sm:$0xf]  ;;  %v2074_v4 = vld [vmem:[%s2952_s24 + $0x3c] sm:$0xf0]  ;;  %v2117_v5 = vor.u32 %v2337_v0, %v2116_v63 }
 0x17a   : > { %v2073_v6 = vor.u32 %v2327_v2, %v2072_v62  ;;  %v2104_v7 = vld [vmem:[%s2952_s24 + $0x68] sm:$0xf]  ;;  %v2334_v8 = vld [vmem:[%s2952_s24 + $0x70] sm:$0xf0]  ;;  %v2077_v9 = vor.u32 %v2326_v3, %v2074_v4  ;;  %v2060_v10 = vld [vmem:[%s2952_s24 + $0x18] sm:$0xf] }
 0x17b   : > { %1000 = vmatpush.bf16.msra.mxu0 %v2109_v43  ;;  %v2324_v11 = vld [vmem:[%s2952_s24 + $0x20] sm:$0xf0]  ;;  %v2323_v12 = vld [vmem:[%s2952_s24 + $0x1c] sm:$0xf]  ;;  %v2062_v13 = vld [vmem:[%s2952_s24 + $0x24] sm:$0xf0]  ;;  %v2105_v14 = vor.u32 %v2334_v8, %v2104_v7 }
 0x17c   : > { %1013 = vmatpush.bf16.msra.mxu1 %v2113_v44  ;;  %v2061_v15 = vor.u32 %v2324_v11, %v2060_v10  ;;  %v2092_v16 = vld [vmem:[%s2952_s24 + $0x50] sm:$0xf]  ;;  %v2331_v17 = vld [vmem:[%s2952_s24 + $0x58] sm:$0xf0]  ;;  %v2065_v18 = vor.u32 %v2323_v12, %v2062_v13  ;;  %v2048_v19 = vld [vmem:[%s2952_s24] sm:$0xf] }
 0x17d   : > { %1025 = vmatpush.bf16.msra.mxu2 %v2129_v60  ;;  %v2321_v20 = vld [vmem:[%s2952_s24 + $0x8] sm:$0xf0]  ;;  %v2320_v21 = vld [vmem:[%s2952_s24 + $0x4] sm:$0xf]  ;;  %v2050_v22 = vld [vmem:[%s2952_s24 + $0xc] sm:$0xf0]  ;;  %v2093_v23 = vor.u32 %v2331_v17, %v2092_v16 }
 0x17e   : > { %v2049_v24 = vor.u32 %v2321_v20, %v2048_v19  ;;  %v3082_v25 = vld [vmem:[#allocation2] sm:$0xff]  ;;  %v2328_v27 = vld [vmem:[%s2952_s24 + $0x40] sm:$0xf0]  ;;  %v2053_v28 = vor.u32 %v2320_v21, %v2050_v22  ;;  %v2068_v31 = vld [vmem:[%s2952_s24 + $0x20] sm:$0xf]  ;;  %vm1046_vm4 = vcmask 261120  }
 0x17f   : > { %1001 = vmatpush.bf16.msra.mxu0 %v2097_v49  ;;  %v2080_v26 = vld [vmem:[%s2952_s24 + $0x38] sm:$0xf]  ;;  %v829_v29 = vpack.c.bf16 %v3082_v25, %v3082_v25  ;;  %v2325_v32 = vld [vmem:[%s2952_s24 + $0x28] sm:$0xf0]  ;;  %v2056_v34 = vld [vmem:[%s2952_s24 + $0x8] sm:$0xf] }
 0x180   : > { %1014 = vmatpush.bf16.msra.mxu1 %v2101_v53  ;;  %v2081_v30 = vor.u32 %v2328_v27, %v2080_v26  ;;  %v2069_v33 = vor.u32 %v2325_v32, %v2068_v31  ;;  %v2322_v35 = vld [vmem:[%s2952_s24 + $0x10] sm:$0xf0]  ;;  %v862_v37 = vld [vmem:[%s2990_s12] sm:$0x7]  ;;  %v2345_v38 = vld [vmem:[%s2995_s1 + $0x8] sm:$0xff]  ;;  %s2736_s24 = smov 32  }
 0x181   : > { %1026 = vmatpush.bf16.msra.mxu2 %v2117_v5  ;;  %v2057_v36 = vor.u32 %v2322_v35, %v2056_v34  ;;  %v864_v39 = vperm.slane %v862_v37, 0  ;;  %v865_v40 = vperm.slane %v862_v37, 1  ;;  %s2737_s19 = smov 96   ;;  %s2738_s12 = smov 64   ;;  %v2344_v53 = vld [vmem:[%s2995_s1] sm:$0xff]  ;;  %v866_v55 = vperm.slane %v862_v37, 2 }
 0x182   : > { %vm1082_vm5 = vcmask 1043456   ;;  %v2510_v0 = vld [vmem:[%s3383_s4] ss:$0 sm:$0xff]  ;;  %vm1066_vm6 = vcmask 64512   ;;  %s3384_s11 = sld [smem:[#allocation33_spill]]  ;;  %p2314_p10 = scmp.ne.s32.totalorder %s2713_s27, 1 }
 0x183   : > { %1002 = vmatpush.bf16.msra.mxu0 %v2085_v61  ;;  %s3386_s17 = sld [smem:[#allocation26_spill]] }
 0x184   : > { %1015 = vmatpush.bf16.msra.mxu1 %v2089_v1  ;;  %s3387_s13 = sld [smem:[#allocation34_spill]] }
 0x185   : > { %1027 = vmatpush.bf16.msra.mxu2 %v2105_v14  ;;  %s3389_s6 = sld [smem:[#allocation35_spill]] }
 0x187   : > { %1003 = vmatpush.bf16.msra.mxu0 %v2073_v6 }
 0x188   : > { %1016 = vmatpush.bf16.msra.mxu1 %v2077_v9  ;;  %s3385_s29 = scalar_lea.vmem %s3384_s11, %s2971_s14 }
 0x189   : > { %1028 = vmatpush.bf16.msra.mxu2 %v2093_v23 }
 0x18a   : > { %s3388_s15 = scalar_lea.vmem %s3387_s13, %s2971_s14 }
 0x18b   : > { %1004 = vmatpush.bf16.msra.mxu0 %v2061_v15  ;;  %s3390_s8 = scalar_lea.vmem %s3389_s6, %s2971_s14 }
 0x18c   : > { %1017 = vmatpush.bf16.msra.mxu1 %v2065_v18 }
 0x18d   : > { %1029 = vmatpush.bf16.msra.mxu2 %v2081_v30 }
 0x18f   : > { %1005 = vmatpush.bf16.msra.mxu0 %v2049_v24 }
 0x190   : > { %1018 = vmatpush.bf16.msra.mxu1 %v2053_v28 }
 0x191   : > { %1030 = vmatpush.bf16.msra.mxu2 %v2069_v33 }
 0x192   : > { %1006 = vmatmul.bf16.vlgmr.msra.gmra.mxu0 %v829_v29 }
 0x193   : > { %1019 = vmatmul.bf16.vlgmr.msra.gmra.mxu1 %v829_v29 }
 0x195   : > { %1031 = vmatpush.bf16.msra.mxu2 %v2057_v36 }
 0x198   : > { %1032 = vmatmul.bf16.vlgmr.msra.gmra.mxu2 %v829_v29 }
 0x199   : > { %1219 = vmatpush.bf16.msrb.mxu2 %v2345_v38 }
 0x19d   : > { %1220 = vmatpush.bf16.msrb.mxu2 %v2344_v53 }
 0x20f   : > { %v1007_v41 = vpop.f32.mrf.mxu0 }
 0x210   : > { %v1008_v42 = vadd.f32 %v1007_v41, %v864_v39  ;;  %v1020_v43 = vpop.f32.mrf.mxu1 }
 0x211   : > { %v1021_v44 = vadd.f32 %v1020_v43, %v865_v40 }
 0x213   : > { %v1037_v45 = vpack.c.bf16 %v1021_v44, %v1008_v42 }
 0x215   : > { %v1044_v46 = vunpack.c.h.b16 %v1037_v45  ;;  %v1104_v51 = vunpack.c.l.b16 %v1037_v45 }
 0x217   : > { %v1009_v47 = vpop.f32.mrf.mxu0  ;;  %v1045_v48 = vpack.c.b16 %v1044_v46, %v1044_v46  ;;  %v1105_v52 = vpack.c.b16 %v1104_v51, %v1104_v51 }
 0x218   : > { %v1022_v49 = vpop.f32.mrf.mxu1 }
 0x219   : > { %1318 = vrot.lane.b32.xlu2 %v1045_v48, %s2736_s24  ;;  %1108 = vrot.lane.b32.xlu1 %v1045_v48, %s2737_s19  ;;  %v1051_v50 = vsel %vm1046_vm4, %v1045_v48, 0 }
 0x21a   : > { %1060 = vmatpush.bf16.xpose.msra.mxu3 %v1051_v50 }
 0x21b   : > { %v1033_v54 = vpop.f32.mrf.mxu2 }
 0x21c   : > { %v1034_v56 = vadd.f32 %v1033_v54, %v866_v55 }
 0x21e   : > { %v1038_v58 = vpack.c.bf16 %v1034_v56, %v1034_v56 }
 0x220   : > { %v1084_v59 = vsel %vm1082_vm5, %v1038_v58, 0  ;;  %v1142_v31 = vunpack.c.l.b16 %v1038_v58 }
 0x221   : > { %1228 = vrot.lane.b32.xlu2 %v1045_v48, %s2738_s12  ;;  %1106 = vrot.lane.b32.xlu1 %v1105_v52, %s2737_s19 }
 0x222   : > { %2142 = vmatmul.msk.bf16.vlgmr.msra.gmra.mxu3 %vm1046_vm4, %v1037_v45  ;;  %v1143_v32 = vpack.c.b16 %v1142_v31, %v1142_v31  ;;  %v2511_v31 = vld [vmem:[%s3385_s29] ss:$0 sm:$0xff] }
 0x223   : > { %v1035_v57 = vpop.f32.mrf.mxu2  ;;  %1093 = vmatpush.bf16.msrb.mxu3 %v1084_v59 }
 0x229   : > { %1226 = vrot.lane.b32.xlu1 %v1105_v52, %s2738_s12 }
 0x273   : > { %v1319_v60 = vpop.permute.xlu2 %1318 }
 0x274   : > { %v1324_v61 = vsel %vm1046_vm4, %v1319_v60, 0  ;;  %v2347_v60 = vld [vmem:[%s2995_s1 + $0x18] sm:$0xff] }
 0x275   : > { %1333 = vmatpush.bf16.xpose.msra.mxu2 %v1324_v61  ;;  %1191 = vmatpush.bf16.msrb.mxu1 %v2347_v60  ;;  %v2362_v60 = vld [vmem:[%s3010_s18 + $0x54] sm:$0xf] }
 0x27b   : > { %v1229_v13 = vpop.permute.xlu2 %1228 }
 0x27c   : > { %v1234_v15 = vsel %vm1046_vm4, %v1229_v13, 0  ;;  %v2351_v13 = vld [vmem:[%s2995_s1 + $0x38] sm:$0xff] }
 0x28b   : > { %v1109_v62 = vpop.permute.xlu1 %1108 }
 0x28c   : > { %v1114_v63 = vsel %vm1046_vm4, %v1109_v62, 0 }
 0x28d   : > { %1123 = vmatpush.bf16.xpose.msra.mxu3 %v1114_v63  ;;  %v2346_v63 = vld [vmem:[%s2995_s1 + $0x10] sm:$0xff] }
 0x28e   : > { %1192 = vmatpush.bf16.msrb.mxu1 %v2346_v63 }
 0x293   : > { %v1107_v16 = vpop.permute.xlu1 %1106 }
 0x29b   : > { %v1227_v17 = vpop.permute.xlu1 %1226 }
 0x2a5   : > { %v1062_v1 = vpop.f32.mrf.mxu3 }
 0x2a6   : > { %v1063_v2 = vadd.f32 %v2510_v0, %v1062_v1 }
 0x2a8   : > { %v1067_v3 = vsel %vm1066_vm6, %v1063_v2, -inf }
 0x2a9   : > { %1068 = vmax.xlane.f32.xlu0 %v1067_v3 }
 0x2ad   : > { %v1064_v4 = vpop.f32.mrf.mxu3 }
 0x31c   : > { %v1069_v5 = vpop.xlane.xlu0 %1068 }
 0x31d   : > { %v1070_v6 = vsub.f32 %v1063_v2, %v1069_v5 }
 0x31f   : > { %v1071_v7 = vmul.f32 1.442695, %v1070_v6 }
 0x321   : > { %2517 = vpow2.f32 %v1071_v7 }
 0x327   : > { %v2518_v8 = vpop.eup %2517 }
 0x328   : > { %v1073_v9 = vsel %vm1066_vm6, %v2518_v8, 0.0 }
 0x329   : > { %1074 = vadd.xlane.f32.xlu0 %v1073_v9 }
 0x33d   : > { %1316 = vrot.lane.b32.xlu0 %v1105_v52, %s2736_s24 }
 0x39c   : > { %v1075_v10 = vpop.xlane.xlu0 %1074 }
 0x39d   : > { %2519 = vrcp.f32 %v1075_v10 }
 0x3a3   : > { %v2520_v11 = vpop.eup %2519 }
 0x3a4   : > { %v1077_v12 = vmul.f32 %v2520_v11, %v2518_v8 }
 0x3a6   : > { %v1078_v14 = vpack.c.bf16 %v1077_v12, %v1077_v12 }
 0x3a8   : > { %2143 = vmatmul.msk.bf16.vlgmr.msrb.gmra.mxu3 %vm1066_vm6, %v1078_v14  ;;  %v2350_v14 = vld [vmem:[%s2995_s1 + $0x30] sm:$0xff] }
 0x3a9   : > { %1243 = vmatpush.bf16.xpose.msrb.mxu3 %v1234_v15  ;;  %v2349_v15 = vld [vmem:[%s2995_s1 + $0x28] sm:$0xff] }
 0x3aa   : > { %1308 = vmatpush.bf16.msra.mxu1 %v2349_v15 }
 0x3af   : > { %v1317_v23 = vpop.permute.xlu0 %1316 }
 0x3b8   : > { %2144 = vmatmul.msk.bf16.vlgmr.msra.gmra.mxu3 %vm1046_vm4, %v1107_v16  ;;  %v2348_v16 = vld [vmem:[%s2995_s1 + $0x20] sm:$0xff] }
 0x3b9   : > { %1309 = vmatpush.bf16.msra.mxu1 %v2348_v16  ;;  %v2206_v16 = vld [vmem:[%s3010_s18 + $0x28] sm:$0xf0] }
 0x3c8   : > { %2164 = vmatmul.msk.bf16.vlgmr.msrb.gmra.mxu3 %vm1046_vm4, %v1227_v17 }
 0x42b   : > { %v1095_v18 = vpop.f32.mrf.mxu3 }
 0x42c   : > { %v1099_v19 = vpack.c.bf16 %v1095_v18, %v1095_v18 }
 0x42e   : > { %2163 = vmatmul.msk.bf16.vlgmr.msrb.gmra.mxu2 %vm1046_vm4, %v1099_v19 }
 0x433   : > { %v1097_v20 = vpop.f32.mrf.mxu3 }
 0x43b   : > { %v1125_v21 = vpop.f32.mrf.mxu3 }
 0x43c   : > { %v1126_v22 = vadd.f32 %v2510_v0, %v1125_v21 }
 0x43e   : > { %2175 = vmatmul.msk.bf16.vlgmr.msra.gmra.mxu2 %vm1046_vm4, %v1317_v23  ;;  %v1129_v24 = vsel %vm1066_vm6, %v1126_v22, -inf }
 0x43f   : > { %1130 = vmax.xlane.f32.xlu2 %v1129_v24 }
 0x443   : > { %v1127_v26 = vpop.f32.mrf.mxu3 }
 0x44b   : > { %v1245_v27 = vpop.f32.mrf.mxu3 }
 0x44c   : > { %v1246_v28 = vadd.f32 %v2510_v0, %v1245_v27 }
 0x44e   : > { %v1249_v29 = vsel %vm1066_vm6, %v1246_v28, -inf }
 0x44f   : > { %1250 = vmax.xlane.f32.xlu0 %v1249_v29 }
 0x453   : > { %v1247_v30 = vpop.f32.mrf.mxu3 }
 0x463   : > { %1351 = vrot.lane.b32.xlu0 %v1143_v32, %s2736_s24 }
 0x4b1   : > { %v3122_v33 = vpop.f32.mrf.mxu2 }
 0x4b2   : > { %v1131_v34 = vpop.xlane.xlu2 %1130 }
 0x4b3   : > { %v1132_v35 = vsub.f32 %v1126_v22, %v1131_v34 }
 0x4b5   : > { %v1133_v36 = vmul.f32 1.442695, %v1132_v35 }
 0x4b7   : > { %2521 = vpow2.f32 %v1133_v36 }
 0x4b9   : > { %v1224_v37 = vpop.f32.mrf.mxu2 }
 0x4ba   : > { %v2739_v37 = vmov 128.0  }
 0x4bd   : > { %v2522_v38 = vpop.eup %2521 }
 0x4be   : > { %v1135_v39 = vsel %vm1066_vm6, %v2522_v38, 0.0 }
 0x4bf   : > { %1136 = vadd.xlane.f32.xlu2 %v1135_v39  ;;  %v2367_v39 = vld [vmem:[%s3010_s18 + $0x74] sm:$0xf0] }
 0x4c1   : > { %v1335_v40 = vpop.f32.mrf.mxu2 }
 0x4c2   : > { %v1336_v41 = vadd.f32 %v2510_v0, %v1335_v40  ;;  %v1251_v42 = vpop.xlane.xlu0 %1250  ;;  %v2366_v40 = vld [vmem:[%s3010_s18 + $0x74] sm:$0xf] }
 0x4c3   : > { %v1252_v43 = vsub.f32 %v1246_v28, %v1251_v42 }
 0x4c4   : > { %v1339_v44 = vsel %vm1066_vm6, %v1336_v41, -inf }
 0x4c5   : > { %v1253_v45 = vmul.f32 1.442695, %v1252_v43  ;;  %1340 = vmax.xlane.f32.xlu1 %v1339_v44 }
 0x4c7   : > { %2523 = vpow2.f32 %v1253_v45 }
 0x4c9   : > { %v1337_v46 = vpop.f32.mrf.mxu2 }
 0x4cd   : > { %v2524_v47 = vpop.eup %2523 }
 0x4ce   : > { %v1255_v48 = vsel %vm1066_vm6, %v2524_v47, 0.0 }
 0x4cf   : > { %1256 = vadd.xlane.f32.xlu1 %v1255_v48 }
 0x4d5   : > { %v1352_v49 = vpop.permute.xlu0 %1351 }
 0x4d6   : > { %v1357_v50 = vsel %vm1082_vm5, %v1352_v49, 0 }
 0x4d7   : > { %1144 = vrot.lane.b32.xlu2 %v1143_v32, %s2737_s19  ;;  %1366 = vmatpush.bf16.msra.mxu3 %v1357_v50 }
 0x532   : > { %v1137_v51 = vpop.xlane.xlu2 %1136 }
 0x533   : > { %2525 = vrcp.f32 %v1137_v51 }
 0x538   : > { %v1341_v52 = vpop.xlane.xlu1 %1340 }
 0x539   : > { %v2526_v53 = vpop.eup %2525  ;;  %v1342_v54 = vsub.f32 %v1336_v41, %v1341_v52  ;;  %v2236_v52 = vld [vmem:[%s3010_s18 + $0x60] sm:$0xf] }
 0x53a   : > { %v1139_v55 = vmul.f32 %v2526_v53, %v2522_v38  ;;  %v1145_v56 = vpop.permute.xlu2 %1144  ;;  %v2244_v38 = vld [vmem:[%s3010_s18 + $0x70] sm:$0xf]  ;;  %v2365_v53 = vld [vmem:[%s3010_s18 + $0x64] sm:$0xf0] }
 0x53b   : > { %v1343_v57 = vmul.f32 1.442695, %v1342_v54  ;;  %v1150_v58 = vsel %vm1082_vm5, %v1145_v56, 0  ;;  %v2245_v41 = vor.u32 %v2367_v39, %v2244_v38  ;;  %v2364_v54 = vld [vmem:[%s3010_s18 + $0x64] sm:$0xf] }
 0x53c   : > { %1159 = vmatpush.bf16.msrb.mxu0 %v1150_v58  ;;  %v1140_v59 = vpack.c.bf16 %v1139_v55, %v1139_v55  ;;  %v2237_v55 = vor.u32 %v2365_v53, %v2236_v52  ;;  %v2238_v56 = vld [vmem:[%s3010_s18 + $0x68] sm:$0xf0]  ;;  %v2228_v58 = vld [vmem:[%s3010_s18 + $0x50] sm:$0xf]  ;;  %v2372_v52 = vld [vmem:[%s3386_s17 + $0x20] sm:$0xff] }
 0x53d   : > { %2527 = vpow2.f32 %v1343_v57  ;;  %v2241_v57 = vor.u32 %v2364_v54, %v2238_v56  ;;  %v2381_v53 = vld [vmem:[%s3386_s17 + $0x68] sm:$0xff]  ;;  %v2371_v54 = vld [vmem:[%s3386_s17 + $0x18] sm:$0xff]  ;;  %v2370_v56 = vld [vmem:[%s3386_s17 + $0x10] sm:$0xff] }
 0x53f   : > { %2145 = vmatmul.msk.bf16.vlgmr.msrb.gmra.mxu0 %vm1066_vm6, %v1140_v59  ;;  %v2363_v59 = vld [vmem:[%s3010_s18 + $0x54] sm:$0xf0] }
 0x542   : > { %v1257_v0 = vpop.xlane.xlu1 %1256 }
 0x543   : > { %v2528_v61 = vpop.eup %2527 }
 0x544   : > { %v1345_v62 = vsel %vm1066_vm6, %v2528_v61, 0.0 }
 0x545   : > { %1346 = vadd.xlane.f32.xlu1 %v1345_v62  ;;  %v2230_v62 = vld [vmem:[%s3010_s18 + $0x58] sm:$0xf0] }
 0x546   : > { %v2233_v63 = vor.u32 %v2362_v60, %v2230_v62  ;;  %v2368_v60 = vld [vmem:[%s3386_s17] sm:$0xff] }
 0x547   : > { %v1466_v62 = vld [vmem:[%s3015_s21] sm:$0x3] }
 0x55e   : > { %1261 = vrot.lane.b32.xlu1 %v1143_v32, %s2738_s12 }
 0x5b8   : > { %v1347_v1 = vpop.xlane.xlu1 %1346 }
 0x5b9   : > { %2529 = vrcp.f32 %v1347_v1  ;;  %v2361_v1 = vld [vmem:[%s3010_s18 + $0x44] sm:$0xf0] }
 0x5ba   : > { %2531 = vrcp.f32 %v1257_v0  ;;  %v2220_v0 = vld [vmem:[%s3010_s18 + $0x40] sm:$0xf] }
 0x5bb   : > { %2533 = vrcp.f32 %v2739_v37 }
 0x5bc   : > { %v1161_v2 = vpop.f32.mrf.mxu0 }
 0x5bd   : > { %v1165_v3 = vpack.c.bf16 %v1161_v2, %v1161_v2  ;;  %v2360_v2 = vld [vmem:[%s3010_s18 + $0x44] sm:$0xf] }
 0x5bf   : > { %v2530_v4 = vpop.eup %2529  ;;  %2154 = vmatmul.msk.bf16.vlgmr.msrb.gmra.mxu1 %vm1046_vm4, %v1165_v3  ;;  %v2221_v3 = vor.u32 %v2361_v1, %v2220_v0  ;;  %v1468_v0 = vperm.slane %v1466_v62, 0 }
 0x5c0   : > { %v1349_v5 = vmul.f32 %v2530_v4, %v2528_v61  ;;  %v2532_v8 = vpop.eup %2531  ;;  %1552 = vmatpush.bf16.msrb.mxu1 %v2245_v41  ;;  %v2229_v61 = vor.u32 %v2363_v59, %v2228_v58  ;;  %v2222_v4 = vld [vmem:[%s3010_s18 + $0x48] sm:$0xf0]  ;;  %v2378_v59 = vld [vmem:[%s3386_s17 + $0x50] sm:$0xff] }
 0x5c1   : > { %v1259_v9 = vmul.f32 %v2532_v8, %v2524_v47  ;;  %v2534_v43 = vpop.eup %2533  ;;  %v2358_v8 = vld [vmem:[%s3010_s18 + $0x34] sm:$0xf]  ;;  %v2369_v58 = vld [vmem:[%s3386_s17 + $0x8] sm:$0xff] }
 0x5c2   : > { %v1350_v6 = vpack.c.bf16 %v1349_v5, %v1349_v5  ;;  %v1417_v44 = vmul.f32 128.0, %v2534_v43  ;;  %vm1421_vm7 = vweird.f32 %v2534_v43  ;;  %v2225_v5 = vor.u32 %v2360_v2, %v2222_v4 }
 0x5c3   : > { %v1260_v12 = vpack.c.bf16 %v1259_v9, %v1259_v9  ;;  %v1469_v4 = vperm.slane %v1466_v62, 1 }
 0x5c4   : > { %v1163_v7 = vpop.f32.mrf.mxu0  ;;  %2176 = vmatmul.msk.bf16.vlgmr.msra.gmra.mxu3 %vm1066_vm6, %v1350_v6  ;;  %v1418_v45 = vsub.f32 1.0, %v1417_v44  ;;  %1553 = vmatpush.bf16.msrb.mxu1 %v2237_v55  ;;  %v2212_v6 = vld [vmem:[%s3010_s18 + $0x30] sm:$0xf]  ;;  %v2513_v44 = vld [vmem:[%s3390_s8] ss:$0 sm:$0xff] }
 0x5c5   : > { %v2359_v7 = vld [vmem:[%s3010_s18 + $0x34] sm:$0xf0]  ;;  %v2380_v55 = vld [vmem:[%s3386_s17 + $0x60] sm:$0xff] }
 0x5c6   : > { %v2213_v9 = vor.u32 %v2359_v7, %v2212_v6 }
 0x5c8   : > { %1554 = vmatpush.bf16.msrb.mxu1 %v2229_v61  ;;  %v2377_v61 = vld [vmem:[%s3386_s17 + $0x48] sm:$0xff] }
 0x5cc   : > { %1555 = vmatpush.bf16.msrb.mxu1 %v2221_v3 }
 0x5d0   : > { %v1262_v10 = vpop.permute.xlu1 %1261  ;;  %1556 = vmatpush.bf16.msrb.mxu1 %v2213_v9 }
 0x5d1   : > { %v1267_v11 = vsel %vm1082_vm5, %v1262_v10, 0  ;;  %v2214_v10 = vld [vmem:[%s3010_s18 + $0x38] sm:$0xf0] }
 0x5d2   : > { %1276 = vmatpush.bf16.msra.mxu0 %v1267_v11  ;;  %v2217_v11 = vor.u32 %v2358_v8, %v2214_v10 }
 0x5d5   : > { %2165 = vmatmul.msk.bf16.vlgmr.msra.gmra.mxu0 %vm1066_vm6, %v1260_v12  ;;  %v2204_v12 = vld [vmem:[%s3010_s18 + $0x20] sm:$0xf] }
 0x5d6   : > { %1398 = vmatpush.bf16.msrb.mxu0 %v2351_v13  ;;  %v2357_v13 = vld [vmem:[%s3010_s18 + $0x24] sm:$0xf0] }
 0x5d7   : > { %v2205_v15 = vor.u32 %v2357_v13, %v2204_v12 }
 0x5d9   : > { %1557 = vmatpush.bf16.msrb.mxu1 %v2205_v15 }
 0x5da   : > { %1399 = vmatpush.bf16.msrb.mxu0 %v2350_v14  ;;  %v2356_v14 = vld [vmem:[%s3010_s18 + $0x24] sm:$0xf] }
 0x63c   : > { %v1194_v17 = vpop.f32.mrf.mxu1 }
 0x63d   : > { %v1223_v28 = vadd.f32 %v3122_v33, %v1194_v17  ;;  %v2246_v33 = vld [vmem:[%s3010_s18 + $0x78] sm:$0xf0]  ;;  %v2209_v17 = vor.u32 %v2356_v14, %v2206_v16 }
 0x63e   : > { %v2249_v42 = vor.u32 %v2366_v40, %v2246_v33  ;;  %v2512_v33 = vld [vmem:[%s3388_s15] ss:$0 sm:$0xff] }
 0x640   : > { %1565 = vmatpush.bf16.msrb.mxu2 %v2249_v42 }
 0x644   : > { %v1196_v18 = vpop.f32.mrf.mxu1  ;;  %1566 = vmatpush.bf16.msrb.mxu2 %v2241_v57  ;;  %v2379_v57 = vld [vmem:[%s3386_s17 + $0x58] sm:$0xff] }
 0x645   : > { %v2196_v18 = vld [vmem:[%s3010_s18 + $0x10] sm:$0xf] }
 0x647   : > { %v1368_v19 = vpop.f32.mrf.mxu3 }
 0x648   : > { %v1372_v20 = vpack.c.bf16 %v1368_v19, %v1368_v19  ;;  %1567 = vmatpush.bf16.msrb.mxu2 %v2233_v63  ;;  %v2355_v19 = vld [vmem:[%s3010_s18 + $0x14] sm:$0xf0]  ;;  %v2376_v63 = vld [vmem:[%s3386_s17 + $0x40] sm:$0xff] }
 0x64a   : > { %2185 = vmatmul.msk.bf16.vlgmr.msrb.gmra.mxu0 %vm1046_vm4, %v1372_v20  ;;  %v2354_v20 = vld [vmem:[%s3010_s18 + $0x14] sm:$0xf] }
 0x64c   : > { %1568 = vmatpush.bf16.msrb.mxu2 %v2225_v5 }
 0x64f   : > { %v1370_v21 = vpop.f32.mrf.mxu3 }
 0x650   : > { %1569 = vmatpush.bf16.msrb.mxu2 %v2217_v11  ;;  %v2197_v21 = vor.u32 %v2355_v19, %v2196_v18 }
 0x652   : > { %v1278_v22 = vpop.f32.mrf.mxu0  ;;  %1558 = vmatpush.bf16.msrb.mxu1 %v2197_v21 }
 0x653   : > { %v1282_v23 = vpack.c.bf16 %v1278_v22, %v1278_v22  ;;  %v2198_v22 = vld [vmem:[%s3010_s18 + $0x18] sm:$0xf0] }
 0x654   : > { %1570 = vmatpush.bf16.msrb.mxu2 %v2209_v17 }
 0x655   : > { %2174 = vmatmul.msk.bf16.vlgmr.msra.gmra.mxu1 %vm1046_vm4, %v1282_v23  ;;  %v2188_v23 = vld [vmem:[%s3010_s18] sm:$0xf] }
 0x65a   : > { %v1280_v24 = vpop.f32.mrf.mxu0 }
 0x65b   : > { %v2353_v24 = vld [vmem:[%s3010_s18 + $0x4] sm:$0xf0] }
 0x6c7   : > { %v1401_v26 = vpop.f32.mrf.mxu0 }
 0x6cf   : > { %v1403_v27 = vpop.f32.mrf.mxu0 }
 0x6d0   : > { %v2352_v27 = vld [vmem:[%s3010_s18 + $0x4] sm:$0xf] }
 0x6d2   : > { %v1311_v29 = vpop.f32.mrf.mxu1 }
 0x6d3   : > { %v1315_v30 = vadd.f32 %v1311_v29, %v1223_v28  ;;  %v2190_v28 = vld [vmem:[%s3010_s18 + $0x8] sm:$0xf0]  ;;  %v2189_v29 = vor.u32 %v2353_v24, %v2188_v23 }
 0x6d5   : > { %v1405_v32 = vadd.f32 %v1401_v26, %v1315_v30  ;;  %v2201_v26 = vor.u32 %v2354_v20, %v2198_v22  ;;  %v2193_v30 = vor.u32 %v2352_v27, %v2190_v28  ;;  %1559 = vmatpush.bf16.msrb.mxu1 %v2189_v29  ;;  %v2514_v29 = vld [vmem:[%s777_s20] ss:$0 sm:$0xff] }
 0x6d7   : > { %v1410_v34 = vadd.f32 %v2511_v31, %v1405_v32  ;;  %1571 = vmatpush.bf16.msrb.mxu2 %v2201_v26  ;;  %v2375_v31 = vld [vmem:[%s3386_s17 + $0x38] sm:$0xff] }
 0x6d8   : > { %1730 = vmatpush.bf16.msrb.mxu3 %v2375_v31 }
 0x6d9   : > { %v1411_v35 = vadd.f32 %v1410_v34, %v3082_v25  ;;  %v1419_v25 = vmul.f32 %v2534_v43, %v1418_v45 }
 0x6da   : > { %v1313_v36 = vpop.f32.mrf.mxu1 }
 0x6db   : > { %1414 = vadd.xlane.f32.xlu2 %v1411_v35  ;;  %v1420_v46 = vadd.f32 %v2534_v43, %v1419_v25  ;;  %1572 = vmatpush.bf16.msrb.mxu2 %v2193_v30 }
 0x6dd   : > { %v3156_v47 = vsel %vm1421_vm7, %v2534_v43, %v1420_v46 }
 0x74e   : > { %v1415_v48 = vpop.xlane.xlu2 %1414 }
 0x74f   : > { %v1423_v49 = vmul.f32 %v3156_v47, %v1415_v48  ;;  %v2374_v48 = vld [vmem:[%s3386_s17 + $0x30] sm:$0xff] }
 0x750   : > { %1731 = vmatpush.bf16.msrb.mxu3 %v2374_v48 }
 0x751   : > { %v3159_v50 = vsub.f32 %v1411_v35, %v1423_v49  ;;  %v2383_v49 = vld [vmem:[%s3386_s17 + $0x78] sm:$0xff] }
 0x752   : > { %1743 = vmatpush.bf16.msra.mxu0 %v2383_v49 }
 0x753   : > { %v1425_v51 = vmul.f32 %v3159_v50, %v3159_v50 }
 0x755   : > { %1426 = vadd.xlane.f32.xlu0 %v1425_v51  ;;  %v2382_v51 = vld [vmem:[%s3386_s17 + $0x70] sm:$0xff] }
 0x756   : > { %1744 = vmatpush.bf16.msra.mxu0 %v2382_v51 }
 0x75a   : > { %1745 = vmatpush.bf16.msra.mxu0 %v2381_v53 }
 0x75e   : > { %1746 = vmatpush.bf16.msra.mxu0 %v2380_v55 }
 0x762   : > { %1747 = vmatpush.bf16.msra.mxu0 %v2379_v57 }
 0x766   : > { %1748 = vmatpush.bf16.msra.mxu0 %v2378_v59 }
 0x76a   : > { %1749 = vmatpush.bf16.msra.mxu0 %v2377_v61 }
 0x76e   : > { %1750 = vmatpush.bf16.msra.mxu0 %v2376_v63 }
 0x7c8   : > { %v1427_v32 = vpop.xlane.xlu0 %1426 }
 0x7c9   : > { %v1428_v34 = vmul.f32 %v1427_v32, %v3156_v47 }
 0x7cb   : > { %v1429_v35 = vadd.f32 1e-12, %v1428_v34 }
 0x7cd   : > { %2535 = vrsqrt.f32 %v1429_v35  ;;  %vm1436_vm9 = vweird.f32 %v1429_v35 }
 0x7d3   : > { %v2536_v36 = vpop.eup %2535 }
 0x7d4   : > { %v1431_v37 = vmul.f32 %v2536_v36, %v1429_v35  ;;  %vm1437_vm8 = vweird.f32 %v2536_v36 }
 0x7d5   : > { %vm1438_vm10 = vmor %vm1436_vm9, %vm1437_vm8 }
 0x7d6   : > { %v1432_v38 = vmul.f32 %v2536_v36, %v1431_v37 }
 0x7d8   : > { %v1433_v39 = vmul.f32 0.5, %v1432_v38 }
 0x7da   : > { %v1434_v40 = vsub.f32 1.5, %v1433_v39 }
 0x7dc   : > { %v1435_v41 = vmul.f32 %v2536_v36, %v1434_v40 }
 0x7de   : > { %v1439_v42 = vsel %vm1438_vm10, %v2536_v36, %v1435_v41 }
 0x7df   : > { %v1440_v43 = vmul.f32 %v1439_v42, %v3159_v50  ;;  %v2373_v50 = vld [vmem:[%s3386_s17 + $0x28] sm:$0xff] }
 0x7e0   : > { %1732 = vmatpush.bf16.msrb.mxu3 %v2373_v50  ;;  %v2515_v50 = vld [vmem:[%s780_s25] ss:$0 sm:$0xff] }
 0x7e1   : > { %v1444_v45 = vmul.f32 %v2512_v33, %v1440_v43 }
 0x7e3   : > { %v3204_v25 = vadd.f32 %v2513_v44, %v1444_v45 }
 0x7e4   : > { %1733 = vmatpush.bf16.msrb.mxu3 %v2372_v52 }
 0x7e5   : > { %v1449_v46 = vpack.c.bf16 %v3204_v25, %v3204_v25 }
 0x7e7   : > { %1560 = vmatmul.bf16.vlgmr.msrb.gmra.mxu1 %v1449_v46  ;;  %1573 = vmatmul.bf16.vlgmr.msrb.gmra.mxu2 %v1449_v46 }
 0x7e8   : > { %1734 = vmatpush.bf16.msrb.mxu3 %v2371_v54 }
 0x7ec   : > { %1735 = vmatpush.bf16.msrb.mxu3 %v2370_v56 }
 0x7f0   : > { %1736 = vmatpush.bf16.msrb.mxu3 %v2369_v58 }
 0x7f4   : > { %1737 = vmatpush.bf16.msrb.mxu3 %v2368_v60 }
 0x864   : > { %v1561_v1 = vpop.f32.mrf.mxu1 }
 0x865   : > { %v1562_v2 = vadd.f32 %v1561_v1, %v1468_v0 }
 0x867   : > { %v1578_v3 = vmul.f32 %v1562_v2, %v1562_v2 }
 0x869   : > { %v1580_v5 = vmul.f32 %v1578_v3, %v1562_v2 }
 0x86a   : > { %v1574_v6 = vpop.f32.mrf.mxu2 }
 0x86b   : > { %v1582_v7 = vmul.f32 0.044715, %v1580_v5  ;;  %v1575_v8 = vadd.f32 %v1574_v6, %v1469_v4 }
 0x86c   : > { %v1563_v9 = vpop.f32.mrf.mxu1 }
 0x86d   : > { %v1584_v10 = vadd.f32 %v1582_v7, %v1562_v2  ;;  %v1579_v11 = vmul.f32 %v1575_v8, %v1575_v8 }
 0x86f   : > { %v1586_v12 = vmul.f32 0.7978846, %v1584_v10  ;;  %v1581_v13 = vmul.f32 %v1579_v11, %v1575_v8 }
 0x871   : > { %2537 = vtanh.f32 %v1586_v12  ;;  %v1583_v14 = vmul.f32 0.044715, %v1581_v13 }
 0x872   : > { %v1576_v15 = vpop.f32.mrf.mxu2 }
 0x873   : > { %v1585_v16 = vadd.f32 %v1583_v14, %v1575_v8 }
 0x875   : > { %v1587_v17 = vmul.f32 0.7978846, %v1585_v16 }
 0x877   : > { %v2538_v18 = vpop.eup %2537  ;;  %2539 = vtanh.f32 %v1587_v17 }
 0x878   : > { %v1590_v19 = vadd.f32 1.0, %v2538_v18 }
 0x87a   : > { %v1592_v20 = vmul.f32 0.5, %v1590_v19 }
 0x87c   : > { %v1594_v21 = vmul.f32 %v1592_v20, %v1562_v2 }
 0x87d   : > { %v2540_v22 = vpop.eup %2539 }
 0x87e   : > { %v1596_v23 = vpack.c.bf16 %v1594_v21, %v1594_v21  ;;  %v1591_v24 = vadd.f32 1.0, %v2540_v22 }
 0x880   : > { %1738 = vmatmul.bf16.vlgmr.msrb.gmra.mxu3 %v1596_v23  ;;  %v1593_v26 = vmul.f32 0.5, %v1591_v24 }
 0x882   : > { %v1595_v27 = vmul.f32 %v1593_v26, %v1575_v8 }
 0x884   : > { %v1597_v28 = vpack.c.bf16 %v1595_v27, %v1595_v27 }
 0x886   : > { %1751 = vmatmul.bf16.vlgmr.msra.gmra.mxu0 %v1597_v28 }
 0x903   : > { %v1739_v30 = vpop.f32.mrf.mxu3  ;;  %v1752_v31 = vpop.f32.mrf.mxu0 }
 0x904   : > { %v1740_v32 = vadd.f32 %v2514_v29, %v1739_v30 }
 0x906   : > { %v1753_v34 = vadd.f32 %v1752_v31, %v1740_v32 }
 0x908   : > { %v1756_v35 = vadd.f32 %v1753_v34, %v3204_v25 }
 0x90a   : > { %1759 = vadd.xlane.f32.xlu1 %v1756_v35 }
 0x90b   : > { %v1741_v36 = vpop.f32.mrf.mxu3  ;;  %v1754_v37 = vpop.f32.mrf.mxu0 }
 0x97d   : > { %v1760_v38 = vpop.xlane.xlu1 %1759 }
 0x97e   : > { %v1761_v39 = vmul.f32 %v1760_v38, %v3156_v47 }
 0x980   : > { %v1762_v40 = vsub.f32 %v1756_v35, %v1761_v39 }
 0x982   : > { %v1763_v41 = vmul.f32 %v1762_v40, %v1762_v40 }
 0x984   : > { %1764 = vadd.xlane.f32.xlu2 %v1763_v41 }
 0x9f7   : > { %v1765_v33 = vpop.xlane.xlu2 %1764 }
 0x9f8   : > { %v1766_v42 = vmul.f32 %v1765_v33, %v3156_v47  ;;  %v2516_v47 = vld [vmem:[%s783_s7] ss:$0 sm:$0xff] }
 0x9fa   : > { %v1767_v43 = vadd.f32 1e-12, %v1766_v42 }
 0x9fc   : > { %2541 = vrsqrt.f32 %v1767_v43  ;;  %vm1774_vm12 = vweird.f32 %v1767_v43 }
 0xa02   : > { %v2542_v44 = vpop.eup %2541 }
 0xa03   : > { %v1769_v45 = vmul.f32 %v2542_v44, %v1767_v43  ;;  %vm1775_vm11 = vweird.f32 %v2542_v44 }
 0xa04   : > { %vm1776_vm13 = vmor %vm1774_vm12, %vm1775_vm11 }
 0xa05   : > { %v1770_v46 = vmul.f32 %v2542_v44, %v1769_v45 }
 0xa07   : > { %v1771_v25 = vmul.f32 0.5, %v1770_v46 }
 0xa09   : > { %v1772_v48 = vsub.f32 1.5, %v1771_v25 }
 0xa0b   : > { %v1773_v49 = vmul.f32 %v2542_v44, %v1772_v48 }
 0xa0d   : > { %v1777_v51 = vsel %vm1776_vm13, %v2542_v44, %v1773_v49 }
 0xa0e   : > { %v1778_v52 = vmul.f32 %v1777_v51, %v1762_v40 }
 0xa10   : > { %v1782_v53 = vmul.f32 %v2515_v50, %v1778_v52  ;;  %1791 = sbr.rel (%p2314_p10) target bundleno = 2582 (0xa16), region = 100 }
 0xa12   : > { %v1786_v54 = vadd.f32 %v2516_v47, %v1782_v53 }
 0xa14   : > { %1787 = vst [vmem:[#allocation2] sm:$0xff] %v1786_v54 }
 0xa15   : > { %1792 = vst [vmem:[%s3031_s10] sm:$0x1] %v1786_v54 }
 0xa16 PF: > { %s3394_s2 = sld [smem:[#allocation16_spill]]  ;;  %s1804_s14 = sshll.u32 %s3031_s10, 4  ;;  %s1805_s14 = int_to_ptr.vmem [resolvable:$true] %s1804_s14 }
 0xa17   : > { %s3395_s9 = sld [smem:[#allocation42_spill]]  ;;  %s3397_s29 = sand.u32 1, %s2693_s22  }
 0xa18   : > { %s1794_s17 = scalar_lea.sflag [#allocation5], %s3397_s29 }
 0xa1d   : > { %s1802_s11 = scalar_lea.hbm %s3395_s9, %s3394_s2  ;;  %s2623_s15 = scalar_lea.hbm %s3395_s9, 2 }
 0xa1e   : > { %s1806_s7 = sshll.u32 %s1802_s11, 4  ;;  %s1807_s7 = int_to_ptr.hbm [resolvable:$true] %s1806_s7 }
 0xa1f   : > { %s2617_s18 = sshra.s32 %s1807_s7, 4  ;;  %s2618_s18 = int_to_ptr.hbm [resolvable:$true] %s2617_s18 }
 0xa20   : > { %s2619_s27 = scalar_lea.hbm %s2618_s18, 1  ;;  %p2624_p1 = scmp.lt.s32.totalorder %s2618_s18, %s3395_s9 }
 0xa21   : > { %p2620_p11 = scmp.ne.s32.totalorder %s2618_s18, %s2619_s27  ;;  %p2625_p4 = scmp.lt.s32.totalorder %s2623_s15, %s2619_s27 }
 0xa23   : > { %p2621_p13 = pnand %p2620_p11, %p2913_p12  ;;  %p2626_p3 = por %p2625_p4, %p2624_p1 }
 0xa25   : > { %p2622_p0 = pneg %p2621_p13 }
 0xa27   : > { %p2627_p5 = pnand %p2626_p3, %p2622_p0 }
 0xa29   : > { %2630 = shalt.err (!%p2627_p5)
}
 0xa2a   : > { %2392 = dma.vmem_to_hbm [thread:$0]  (%p2913_p12), %s1805_s14, 16, %s1807_s7, %s1794_s17  }
 0xa2b PF: > { %s3398_s10 = sld [smem:[#allocation19_spill]] }
 0xa2c   : > { %s3399_s6 = sld [smem:[#allocation12_spill]] }
 0xa31   : > { %p2406_p6 = scmp.ge.s32.totalorder %s3398_s10, 2 }
 0xa32   : > { %s1818_s21 = sand.u32 1, %s3399_s6  }
 0xa33   : > { %p2402_p7 = pnand %p2406_p6, %p2923_p2  ;;  %s1819_s0 = scalar_lea.sflag [#allocation5], %s1818_s21 }
 0xa35   : > { %p2403_p9 = pneg %p2402_p7 }
 0xa37   : > { %2684 = dma.done.wait (%p2403_p9), %s1819_s0, 16  }
 0xa38   : > { %2686 = vsyncadd (%p2403_p9), %s1819_s0, 4294967280  ;;  %s35_s0 = sadd.s32 1, %s3398_s10   ;;  %s3401_s16 = sld [smem:[#allocation13_spill]] }
 0xa39   : > { %p32_p8 = scmp.ge.s32.totalorder %s35_s0, 6   ;;  %s3402_s23 = sld [smem:[#allocation23_spill]] }
 0xa3a   : > { %s3403_s24 = sld [smem:[#allocation14_spill]]  ;;  %s3410_s21 = smov %s2693_s22 }
 0xa3b   : > { %s3404_s25 = sld [smem:[#allocation15_spill]] }
 0xa3c   : > { %s3405_s26 = sld [smem:[#allocation22_spill]]  ;;  %34 = sbr.rel (!%p32_p8) target bundleno = 28 (0x1c), region = 186 }
 0xa3d   : > { %s3406_s27 = sld [smem:[#allocation17_spill]] }
 0xa3e   : > { %s3407_s28 = sld [smem:[#allocation18_spill]]  ;;  %s3411_s22 = smov %s3401_s16 }
 0xa3f   : > { %s3408_s29 = sld [smem:[#allocation20_spill]] }
 0xa40   : > { %s3409_s30 = sld [smem:[#allocation21_spill]] }
 0xa41   :  { %1824 = vsyncpa [#allocation4], 1 }
 0xa42   :  { %1826 = vsyncpa [#allocation4 + $0x1], 1 }
 0xa43   :  { %1827 = vsyncpa [#allocation7], 1 }
 0xa44   :  { %1829 = vsyncpa [#allocation7 + $0x1], 1 }
 0xa45   :  { %1830 = vsyncpa [#allocation5], 1 }
 0xa46   :  { %1832 = vsyncpa [#allocation5 + $0x1], 1 }

</bundles_post_ra>
